<compile_context>
chip_gen: v7x
topology: tpu7x:2x2x1
jax: 0.10.0
libtpu: 0.0.40
codegen_flags: <defaults>
</compile_context>

<pallas_src>
import jax
import jax.numpy as jnp
from jax.experimental import pallas as pl
from jax.experimental.pallas import tpu as pltpu

# ----- small, module-consistent hyper-parameters -----
VOCAB = 20
E = 8            # embed_dims
H = 8            # lstm_hidden_size
C = 8            # cnn_out_channels
K = 3            # conv kernel size, padding = K // 3 = 1
B = 2            # batch (sentence pairs)
S = 8            # sequence length
NB = 2 * B       # both sentences stacked along batch for one bi-LSTM pass
G4 = 4 * H       # packed gate width per direction (columns: i | f | o | g)
FEAT = 6 * H + 2 * C   # matchlist feature dim (= 64)


def _sigmoid_approx(x):
    # exp + approximate reciprocal both ride the EUP slot (off the VALU path).
    return pl.reciprocal(1.0 + jnp.exp(-x), approx=True)


def _sigmoid_exact(x):
    return 1.0 / (1.0 + jnp.exp(-x))


def rnncnn_kernel(emb_ref, lens_ref,
                  wih_ref, whh_f_ref, whh_b_ref,
                  wcnn_ref, w_head_ref, b_head_ref, w_out_ref, b_out_ref,
                  out_ref, seq_ref):
    # ---- hoisted input projection, both directions, both sentences: 1 dot ----
    emb = emb_ref[...]                                        # (S*NB, E)
    xproj = jnp.dot(emb, wih_ref[...],
                    preferred_element_type=jnp.float32)       # (S*NB, 8H) [fwd | bwd]

    lens = lens_ref[...]                                       # (NB, 1) int32
    masks = [(lens > t).astype(jnp.float32) for t in range(S)]  # each (NB, 1)

    whh_f = whh_f_ref[...]                                     # (H, 4H)
    whh_b = whh_b_ref[...]

    def step(xp, h, c, whh, m):
        gates = xp + jnp.dot(h, whh, preferred_element_type=jnp.float32)  # (NB, 4H)
        sg = _sigmoid_approx(gates[:, :3 * H])                 # i | f | o in one call
        i = sg[:, :H]
        f = sg[:, H:2 * H]
        o = sg[:, 2 * H:3 * H]
        g = jnp.tanh(gates[:, 3 * H:])
        c_new = f * c + i * g
        h_new = o * jnp.tanh(c_new)
        h_out = m * h_new                         # padded positions -> 0 (pad_packed)
        h = h + m * (h_new - h)                   # freeze state past sequence length
        c = c + m * (c_new - c)
        return h_out, h, c

    zeros = jnp.zeros((NB, H), jnp.float32)

    # forward direction
    h, c = zeros, zeros
    for t in range(S):
        xp = xproj[t * NB:(t + 1) * NB, 0:G4]
        h_out, h, c = step(xp, h, c, whh_f, masks[t])
        seq_ref[pl.ds(t * NB, NB), pl.ds(0, H)] = h_out
    h_fwd = h

    # backward direction (starts at t = len-1 with zero state, like packed LSTM)
    h, c = zeros, zeros
    for t in range(S - 1, -1, -1):
        xp = xproj[t * NB:(t + 1) * NB, G4:2 * G4]
        h_out, h, c = step(xp, h, c, whh_b, masks[t])
        seq_ref[pl.ds(t * NB, NB), pl.ds(H, H)] = h_out
    h_bwd = h

    # ---- Conv1d(2H->C, k=3, pad=1) + tanh + kmax(k=1): ONE MXU dot ----
    # seq_ref rows ordered t*NB + b, lanes [fwd | bwd]; wcnn columns tap-major.
    taps = jnp.dot(seq_ref[...], wcnn_ref[...],
                   preferred_element_type=jnp.float32)         # (S*NB, K*C)
    best = None
    for s in range(S):
        acc = None
        for k in range(K):
            idx = s - 1 + k                                    # padding = 1
            if 0 <= idx < S:
                piece = taps[idx * NB:(idx + 1) * NB, k * C:(k + 1) * C]
                acc = piece if acc is None else acc + piece
        val = jnp.tanh(acc)
        best = val if best is None else jnp.maximum(best, val)
    # best: (NB, C) — rows [0:B] = kmax(sen1), rows [B:NB] = kmax(sen2)

    # ---- match features (PyTorch concat order: |h1-h2|, max, h1*h2, kmax1, kmax2) ----
    h1f, h2f = h_fwd[:B, :], h_fwd[B:, :]
    h1b, h2b = h_bwd[:B, :], h_bwd[B:, :]
    kmax1, kmax2 = best[:B, :], best[B:, :]
    matchlist = jnp.concatenate(
        [jnp.abs(h1f - h2f), jnp.abs(h1b - h2b),
         jnp.maximum(h1f, h2f), jnp.maximum(h1b, h2b),
         h1f * h2f, h1b * h2b,
         kmax1, kmax2], axis=1)                                # (B, FEAT)

    # ---- fused MLP head: 2 dots total ----
    head = (jnp.dot(matchlist, w_head_ref[...],
                    preferred_element_type=jnp.float32)
            + b_head_ref[...])                                 # (B, 80) = [relu | sig]
    relu_feat = jnp.maximum(head[:, :32], 0.0)
    sig_feat = _sigmoid_approx(head[:, 32:])
    act = jnp.concatenate([relu_feat, sig_feat], axis=1)       # (B, 80)
    out_pre = (jnp.dot(act, w_out_ref[...],
                       preferred_element_type=jnp.float32)
               + b_out_ref[...])
    out_ref[...] = _sigmoid_exact(out_pre)                     # exact on the output


def rnncnn_forward(sen1, sen2, len1, len2, params):
    # Embedding lookup (glue) — padding_idx=0 row is zero in the table.
    emb1 = params["emb"][sen1].astype(jnp.float32)             # (B, S, E)
    emb2 = params["emb"][sen2].astype(jnp.float32)
    emb = jnp.concatenate([emb1, emb2], axis=0)                # (NB, S, E)
    emb = jnp.transpose(emb, (1, 0, 2)).reshape(S * NB, E)     # row = t*NB + b
    lens = jnp.concatenate([len1, len2], axis=0).astype(jnp.int32).reshape(NB, 1)

    args = [emb, lens,
            params["wih"], params["whh_f"], params["whh_b"],
            params["wcnn"], params["w_head"], params["b_head"],
            params["w_out"], params["b_out"]]

    def full_spec(x):
        nd = x.ndim
        return pl.BlockSpec(x.shape, lambda i, nd=nd: (0,) * nd)

    return pl.pallas_call(
        rnncnn_kernel,
        out_shape=jax.ShapeDtypeStruct((B, 1), jnp.float32),
        grid=(1,),
        in_specs=[full_spec(a) for a in args],
        out_specs=pl.BlockSpec((B, 1), lambda i: (0, 0)),
        scratch_shapes=[pltpu.VMEM((S * NB, 2 * H), jnp.float32)],
    )(*args)


def init_params(key):
    ks = jax.random.split(key, 12)

    def rnd(k, shape, scale=0.2):
        return scale * jax.random.normal(k, shape, jnp.float32)

    emb = rnd(ks[0], (VOCAB, E)).at[0].set(0.0)                # padding_idx = 0

    # PyTorch LSTM weights: weight_ih (4H, E) / weight_hh (4H, H); gate rows i,f,g,o.
    wih_f_pt = rnd(ks[1], (4 * H, E))
    whh_f_pt = rnd(ks[2], (4 * H, H))
    wih_b_pt = rnd(ks[3], (4 * H, E))
    whh_b_pt = rnd(ks[4], (4 * H, H))

    def pack_gates(w_pt, in_dim):
        # (4H, in) -> (in, 4H) with gate columns reordered to [i, f, o, g]
        g = w_pt.reshape(4, H, in_dim)
        return jnp.concatenate([g[j].T for j in (0, 1, 3, 2)], axis=1)

    wih_f = pack_gates(wih_f_pt, E)                            # (E, 4H)
    wih_b = pack_gates(wih_b_pt, E)
    wih = jnp.concatenate([wih_f, wih_b], axis=1)              # (E, 8H): fwd | bwd
    whh_f = pack_gates(whh_f_pt, H)                            # (H, 4H)
    whh_b = pack_gates(whh_b_pt, H)

    # PyTorch Conv1d weight (C_out, C_in=2H, K) -> (2H, K*C), tap-major columns;
    # C_in order is [fwd(0..H-1), bwd(0..H-1)], matching the bi-LSTM output concat.
    wcnn_pt = rnd(ks[5], (C, 2 * H, K))
    wcnn = jnp.concatenate([wcnn_pt[:, :, k].T for k in range(K)], axis=1)

    # MLP head: fuse relu/sigmoid linears into one (FEAT, 80) matrix + (1, 80) bias.
    w_relu_pt = rnd(ks[6], (32, FEAT))
    b_relu = rnd(ks[7], (32,))
    w_sig_pt = rnd(ks[8], (48, FEAT))
    b_sig = rnd(ks[9], (48,))
    w_head = jnp.concatenate([w_relu_pt.T, w_sig_pt.T], axis=1)   # (FEAT, 80)
    b_head = jnp.concatenate([b_relu, b_sig]).reshape(1, 80)
    w_out = rnd(ks[10], (1, 80)).T                                # (80, 1)
    b_out = rnd(ks[11], (1,)).reshape(1, 1)

    return dict(emb=emb, wih=wih, whh_f=whh_f, whh_b=whh_b, wcnn=wcnn,
                w_head=w_head, b_head=b_head, w_out=w_out, b_out=b_out)


if __name__ == "__main__":
    key = jax.random.PRNGKey(0)
    pkey, k1, k2 = jax.random.split(key, 3)
    params = init_params(pkey)

    len1 = jnp.array([8, 5], jnp.int32)
    len2 = jnp.array([6, 8], jnp.int32)
    sen1 = jax.random.randint(k1, (B, S), 1, VOCAB, jnp.int32)
    sen2 = jax.random.randint(k2, (B, S), 1, VOCAB, jnp.int32)
    pos = jnp.arange(S)[None, :]
    sen1 = jnp.where(pos < len1[:, None], sen1, 0)   # pad with index 0 past length
    sen2 = jnp.where(pos < len2[:, None], sen2, 0)

    out = rnncnn_forward(sen1, sen2, len1, len2, params)
    out = jax.block_until_ready(out)

    assert out.shape == (B, 1), out.shape
    assert bool(jnp.all(jnp.isfinite(out)))
    assert bool(jnp.all((out > 0.0) & (out < 1.0)))   # sigmoid output
    print("KERNEL_OK")
</pallas_src>

<mosaic_0001>
module attributes {stable_mosaic.version = 11 : i64} {
  func.func @rnncnn_kernel(%arg0: i32, %arg1: memref<32x8xf32, #tpu.memory_space<vmem>>, %arg2: memref<4x1xi32, #tpu.memory_space<vmem>>, %arg3: memref<8x64xf32, #tpu.memory_space<vmem>>, %arg4: memref<8x32xf32, #tpu.memory_space<vmem>>, %arg5: memref<8x32xf32, #tpu.memory_space<vmem>>, %arg6: memref<16x24xf32, #tpu.memory_space<vmem>>, %arg7: memref<64x80xf32, #tpu.memory_space<vmem>>, %arg8: memref<1x80xf32, #tpu.memory_space<vmem>>, %arg9: memref<80x1xf32, #tpu.memory_space<vmem>>, %arg10: memref<1x1xf32, #tpu.memory_space<vmem>>, %arg11: memref<2x1xf32, #tpu.memory_space<vmem>>, %arg12: memref<32x16xf32, #tpu.memory_space<vmem>>) attributes {dimension_semantics = [#tpu.dimension_semantics<arbitrary>], iteration_bounds = array<i64: 1>, scalar_prefetch = 0 : i64, scratch_operands = 1 : i64, tpu.core_type = #tpu.core_type<tc>, window_params = [{pipeline_mode = #tpu.pipeline_mode<synchronous>, transform_indices = @transform_0, window_bounds = array<i64: 32, 8>}, {pipeline_mode = #tpu.pipeline_mode<synchronous>, transform_indices = @transform_1, window_bounds = array<i64: 4, 1>}, {pipeline_mode = #tpu.pipeline_mode<synchronous>, transform_indices = @transform_2, window_bounds = array<i64: 8, 64>}, {pipeline_mode = #tpu.pipeline_mode<synchronous>, transform_indices = @transform_3, window_bounds = array<i64: 8, 32>}, {pipeline_mode = #tpu.pipeline_mode<synchronous>, transform_indices = @transform_4, window_bounds = array<i64: 8, 32>}, {pipeline_mode = #tpu.pipeline_mode<synchronous>, transform_indices = @transform_5, window_bounds = array<i64: 16, 24>}, {pipeline_mode = #tpu.pipeline_mode<synchronous>, transform_indices = @transform_6, window_bounds = array<i64: 64, 80>}, {pipeline_mode = #tpu.pipeline_mode<synchronous>, transform_indices = @transform_7, window_bounds = array<i64: 1, 80>}, {pipeline_mode = #tpu.pipeline_mode<synchronous>, transform_indices = @transform_8, window_bounds = array<i64: 80, 1>}, {pipeline_mode = #tpu.pipeline_mode<synchronous>, transform_indices = @transform_9, window_bounds = array<i64: 1, 1>}, {pipeline_mode = #tpu.pipeline_mode<synchronous>, transform_indices = @transform_10, window_bounds = array<i64: 2, 1>}]} {
    %c0 = arith.constant 0 : index
    %c0_0 = arith.constant 0 : index
    %0 = vector.load %arg1[%c0, %c0_0] : memref<32x8xf32, #tpu.memory_space<vmem>>, vector<32x8xf32>
    %c0_1 = arith.constant 0 : index
    %c0_2 = arith.constant 0 : index
    %1 = vector.load %arg3[%c0_1, %c0_2] : memref<8x64xf32, #tpu.memory_space<vmem>>, vector<8x64xf32>
    %cst = arith.constant dense<0.000000e+00> : vector<32x64xf32>
    %2 = tpu.matmul %0, %1, %cst {dimension_numbers = #tpu.dot_dimension_numbers<[1], [0], [0], [1], [0, 0, 1, 1], [], []>} : vector<32x8xf32>, vector<8x64xf32>, vector<32x64xf32> -> vector<32x64xf32>
    %c0_3 = arith.constant 0 : index
    %c0_4 = arith.constant 0 : index
    %3 = vector.load %arg2[%c0_3, %c0_4] : memref<4x1xi32, #tpu.memory_space<vmem>>, vector<4x1xi32>
    %c0_i32 = arith.constant 0 : i32
    %4 = vector.broadcast %c0_i32 : i32 to vector<4x1xi32>
    %5 = arith.cmpi sgt, %3, %4 : vector<4x1xi32>
    %6 = arith.extui %5 : vector<4x1xi1> to vector<4x1xi32>
    %7 = arith.sitofp %6 : vector<4x1xi32> to vector<4x1xf32>
    %c1_i32 = arith.constant 1 : i32
    %8 = vector.broadcast %c1_i32 : i32 to vector<4x1xi32>
    %9 = arith.cmpi sgt, %3, %8 : vector<4x1xi32>
    %10 = arith.extui %9 : vector<4x1xi1> to vector<4x1xi32>
    %11 = arith.sitofp %10 : vector<4x1xi32> to vector<4x1xf32>
    %c2_i32 = arith.constant 2 : i32
    %12 = vector.broadcast %c2_i32 : i32 to vector<4x1xi32>
    %13 = arith.cmpi sgt, %3, %12 : vector<4x1xi32>
    %14 = arith.extui %13 : vector<4x1xi1> to vector<4x1xi32>
    %15 = arith.sitofp %14 : vector<4x1xi32> to vector<4x1xf32>
    %c3_i32 = arith.constant 3 : i32
    %16 = vector.broadcast %c3_i32 : i32 to vector<4x1xi32>
    %17 = arith.cmpi sgt, %3, %16 : vector<4x1xi32>
    %18 = arith.extui %17 : vector<4x1xi1> to vector<4x1xi32>
    %19 = arith.sitofp %18 : vector<4x1xi32> to vector<4x1xf32>
    %c4_i32 = arith.constant 4 : i32
    %20 = vector.broadcast %c4_i32 : i32 to vector<4x1xi32>
    %21 = arith.cmpi sgt, %3, %20 : vector<4x1xi32>
    %22 = arith.extui %21 : vector<4x1xi1> to vector<4x1xi32>
    %23 = arith.sitofp %22 : vector<4x1xi32> to vector<4x1xf32>
    %c5_i32 = arith.constant 5 : i32
    %24 = vector.broadcast %c5_i32 : i32 to vector<4x1xi32>
    %25 = arith.cmpi sgt, %3, %24 : vector<4x1xi32>
    %26 = arith.extui %25 : vector<4x1xi1> to vector<4x1xi32>
    %27 = arith.sitofp %26 : vector<4x1xi32> to vector<4x1xf32>
    %c6_i32 = arith.constant 6 : i32
    %28 = vector.broadcast %c6_i32 : i32 to vector<4x1xi32>
    %29 = arith.cmpi sgt, %3, %28 : vector<4x1xi32>
    %30 = arith.extui %29 : vector<4x1xi1> to vector<4x1xi32>
    %31 = arith.sitofp %30 : vector<4x1xi32> to vector<4x1xf32>
    %c7_i32 = arith.constant 7 : i32
    %32 = vector.broadcast %c7_i32 : i32 to vector<4x1xi32>
    %33 = arith.cmpi sgt, %3, %32 : vector<4x1xi32>
    %34 = arith.extui %33 : vector<4x1xi1> to vector<4x1xi32>
    %35 = arith.sitofp %34 : vector<4x1xi32> to vector<4x1xf32>
    %c0_5 = arith.constant 0 : index
    %c0_6 = arith.constant 0 : index
    %36 = vector.load %arg4[%c0_5, %c0_6] : memref<8x32xf32, #tpu.memory_space<vmem>>, vector<8x32xf32>
    %c0_7 = arith.constant 0 : index
    %c0_8 = arith.constant 0 : index
    %37 = vector.load %arg5[%c0_7, %c0_8] : memref<8x32xf32, #tpu.memory_space<vmem>>, vector<8x32xf32>
    %cst_9 = arith.constant 0.000000e+00 : f32
    %38 = vector.broadcast %cst_9 : f32 to vector<4x8xf32>
    %39 = vector.extract_strided_slice %2 {offsets = [0, 0], sizes = [4, 32], strides = [1, 1]} : vector<32x64xf32> to vector<4x32xf32>
    %cst_10 = arith.constant dense<0.000000e+00> : vector<4x32xf32>
    %40 = tpu.matmul %38, %36, %cst_10 {dimension_numbers = #tpu.dot_dimension_numbers<[1], [0], [0], [1], [0, 0, 1, 1], [], []>} : vector<4x8xf32>, vector<8x32xf32>, vector<4x32xf32> -> vector<4x32xf32>
    %41 = arith.addf %39, %40 : vector<4x32xf32>
    %42 = vector.extract_strided_slice %41 {offsets = [0, 0], sizes = [4, 24], strides = [1, 1]} : vector<4x32xf32> to vector<4x24xf32>
    %cst_11 = arith.constant 0.000000e+00 : f32
    %43 = vector.broadcast %cst_11 : f32 to vector<4x24xf32>
    %44 = arith.subf %43, %42 : vector<4x24xf32>
    %45 = math.exp %44 : vector<4x24xf32>
    %cst_12 = arith.constant 1.000000e+00 : f32
    %46 = vector.broadcast %cst_12 : f32 to vector<4x24xf32>
    %47 = arith.addf %46, %45 : vector<4x24xf32>
    %48 = tpu.reciprocal %47 {approx = true} : vector<4x24xf32> -> vector<4x24xf32>
    %49 = vector.extract_strided_slice %48 {offsets = [0, 0], sizes = [4, 8], strides = [1, 1]} : vector<4x24xf32> to vector<4x8xf32>
    %50 = vector.extract_strided_slice %48 {offsets = [0, 8], sizes = [4, 8], strides = [1, 1]} : vector<4x24xf32> to vector<4x8xf32>
    %51 = vector.extract_strided_slice %48 {offsets = [0, 16], sizes = [4, 8], strides = [1, 1]} : vector<4x24xf32> to vector<4x8xf32>
    %52 = vector.extract_strided_slice %41 {offsets = [0, 24], sizes = [4, 8], strides = [1, 1]} : vector<4x32xf32> to vector<4x8xf32>
    %53 = math.tanh %52 : vector<4x8xf32>
    %54 = arith.mulf %50, %38 : vector<4x8xf32>
    %55 = arith.mulf %49, %53 : vector<4x8xf32>
    %56 = arith.addf %54, %55 : vector<4x8xf32>
    %57 = math.tanh %56 : vector<4x8xf32>
    %58 = arith.mulf %51, %57 : vector<4x8xf32>
    %59 = vector.broadcast %7 : vector<4x1xf32> to vector<4x8xf32>
    %60 = arith.mulf %59, %58 : vector<4x8xf32>
    %61 = arith.subf %58, %38 : vector<4x8xf32>
    %62 = vector.broadcast %7 : vector<4x1xf32> to vector<4x8xf32>
    %63 = arith.mulf %62, %61 : vector<4x8xf32>
    %64 = arith.addf %38, %63 : vector<4x8xf32>
    %65 = arith.subf %56, %38 : vector<4x8xf32>
    %66 = vector.broadcast %7 : vector<4x1xf32> to vector<4x8xf32>
    %67 = arith.mulf %66, %65 : vector<4x8xf32>
    %68 = arith.addf %38, %67 : vector<4x8xf32>
    %c0_13 = arith.constant 0 : index
    %c0_14 = arith.constant 0 : index
    %69 = vector.load %arg12[%c0_13, %c0_14] : memref<32x16xf32, #tpu.memory_space<vmem>>, vector<4x8xf32>
    tpu.vector_store %arg12[%c0_13, %c0_14], %60 {strides = array<i32>} : memref<32x16xf32, #tpu.memory_space<vmem>>, vector<4x8xf32>,
    %70 = vector.extract_strided_slice %2 {offsets = [4, 0], sizes = [4, 32], strides = [1, 1]} : vector<32x64xf32> to vector<4x32xf32>
    %cst_15 = arith.constant dense<0.000000e+00> : vector<4x32xf32>
    %71 = tpu.matmul %64, %36, %cst_15 {dimension_numbers = #tpu.dot_dimension_numbers<[1], [0], [0], [1], [0, 0, 1, 1], [], []>} : vector<4x8xf32>, vector<8x32xf32>, vector<4x32xf32> -> vector<4x32xf32>
    %72 = arith.addf %70, %71 : vector<4x32xf32>
    %73 = vector.extract_strided_slice %72 {offsets = [0, 0], sizes = [4, 24], strides = [1, 1]} : vector<4x32xf32> to vector<4x24xf32>
    %cst_16 = arith.constant 0.000000e+00 : f32
    %74 = vector.broadcast %cst_16 : f32 to vector<4x24xf32>
    %75 = arith.subf %74, %73 : vector<4x24xf32>
    %76 = math.exp %75 : vector<4x24xf32>
    %cst_17 = arith.constant 1.000000e+00 : f32
    %77 = vector.broadcast %cst_17 : f32 to vector<4x24xf32>
    %78 = arith.addf %77, %76 : vector<4x24xf32>
    %79 = tpu.reciprocal %78 {approx = true} : vector<4x24xf32> -> vector<4x24xf32>
    %80 = vector.extract_strided_slice %79 {offsets = [0, 0], sizes = [4, 8], strides = [1, 1]} : vector<4x24xf32> to vector<4x8xf32>
    %81 = vector.extract_strided_slice %79 {offsets = [0, 8], sizes = [4, 8], strides = [1, 1]} : vector<4x24xf32> to vector<4x8xf32>
    %82 = vector.extract_strided_slice %79 {offsets = [0, 16], sizes = [4, 8], strides = [1, 1]} : vector<4x24xf32> to vector<4x8xf32>
    %83 = vector.extract_strided_slice %72 {offsets = [0, 24], sizes = [4, 8], strides = [1, 1]} : vector<4x32xf32> to vector<4x8xf32>
    %84 = math.tanh %83 : vector<4x8xf32>
    %85 = arith.mulf %81, %68 : vector<4x8xf32>
    %86 = arith.mulf %80, %84 : vector<4x8xf32>
    %87 = arith.addf %85, %86 : vector<4x8xf32>
    %88 = math.tanh %87 : vector<4x8xf32>
    %89 = arith.mulf %82, %88 : vector<4x8xf32>
    %90 = vector.broadcast %11 : vector<4x1xf32> to vector<4x8xf32>
    %91 = arith.mulf %90, %89 : vector<4x8xf32>
    %92 = arith.subf %89, %64 : vector<4x8xf32>
    %93 = vector.broadcast %11 : vector<4x1xf32> to vector<4x8xf32>
    %94 = arith.mulf %93, %92 : vector<4x8xf32>
    %95 = arith.addf %64, %94 : vector<4x8xf32>
    %96 = arith.subf %87, %68 : vector<4x8xf32>
    %97 = vector.broadcast %11 : vector<4x1xf32> to vector<4x8xf32>
    %98 = arith.mulf %97, %96 : vector<4x8xf32>
    %99 = arith.addf %68, %98 : vector<4x8xf32>
    %c4 = arith.constant 4 : index
    %c0_18 = arith.constant 0 : index
    %100 = vector.load %arg12[%c4, %c0_18] : memref<32x16xf32, #tpu.memory_space<vmem>>, vector<4x8xf32>
    tpu.vector_store %arg12[%c4, %c0_18], %91 {strides = array<i32>} : memref<32x16xf32, #tpu.memory_space<vmem>>, vector<4x8xf32>,
    %101 = vector.extract_strided_slice %2 {offsets = [8, 0], sizes = [4, 32], strides = [1, 1]} : vector<32x64xf32> to vector<4x32xf32>
    %cst_19 = arith.constant dense<0.000000e+00> : vector<4x32xf32>
    %102 = tpu.matmul %95, %36, %cst_19 {dimension_numbers = #tpu.dot_dimension_numbers<[1], [0], [0], [1], [0, 0, 1, 1], [], []>} : vector<4x8xf32>, vector<8x32xf32>, vector<4x32xf32> -> vector<4x32xf32>
    %103 = arith.addf %101, %102 : vector<4x32xf32>
    %104 = vector.extract_strided_slice %103 {offsets = [0, 0], sizes = [4, 24], strides = [1, 1]} : vector<4x32xf32> to vector<4x24xf32>
    %cst_20 = arith.constant 0.000000e+00 : f32
    %105 = vector.broadcast %cst_20 : f32 to vector<4x24xf32>
    %106 = arith.subf %105, %104 : vector<4x24xf32>
    %107 = math.exp %106 : vector<4x24xf32>
    %cst_21 = arith.constant 1.000000e+00 : f32
    %108 = vector.broadcast %cst_21 : f32 to vector<4x24xf32>
    %109 = arith.addf %108, %107 : vector<4x24xf32>
    %110 = tpu.reciprocal %109 {approx = true} : vector<4x24xf32> -> vector<4x24xf32>
    %111 = vector.extract_strided_slice %110 {offsets = [0, 0], sizes = [4, 8], strides = [1, 1]} : vector<4x24xf32> to vector<4x8xf32>
    %112 = vector.extract_strided_slice %110 {offsets = [0, 8], sizes = [4, 8], strides = [1, 1]} : vector<4x24xf32> to vector<4x8xf32>
    %113 = vector.extract_strided_slice %110 {offsets = [0, 16], sizes = [4, 8], strides = [1, 1]} : vector<4x24xf32> to vector<4x8xf32>
    %114 = vector.extract_strided_slice %103 {offsets = [0, 24], sizes = [4, 8], strides = [1, 1]} : vector<4x32xf32> to vector<4x8xf32>
    %115 = math.tanh %114 : vector<4x8xf32>
    %116 = arith.mulf %112, %99 : vector<4x8xf32>
    %117 = arith.mulf %111, %115 : vector<4x8xf32>
    %118 = arith.addf %116, %117 : vector<4x8xf32>
    %119 = math.tanh %118 : vector<4x8xf32>
    %120 = arith.mulf %113, %119 : vector<4x8xf32>
    %121 = vector.broadcast %15 : vector<4x1xf32> to vector<4x8xf32>
    %122 = arith.mulf %121, %120 : vector<4x8xf32>
    %123 = arith.subf %120, %95 : vector<4x8xf32>
    %124 = vector.broadcast %15 : vector<4x1xf32> to vector<4x8xf32>
    %125 = arith.mulf %124, %123 : vector<4x8xf32>
    %126 = arith.addf %95, %125 : vector<4x8xf32>
    %127 = arith.subf %118, %99 : vector<4x8xf32>
    %128 = vector.broadcast %15 : vector<4x1xf32> to vector<4x8xf32>
    %129 = arith.mulf %128, %127 : vector<4x8xf32>
    %130 = arith.addf %99, %129 : vector<4x8xf32>
    %c8 = arith.constant 8 : index
    %c0_22 = arith.constant 0 : index
    %131 = vector.load %arg12[%c8, %c0_22] : memref<32x16xf32, #tpu.memory_space<vmem>>, vector<4x8xf32>
    tpu.vector_store %arg12[%c8, %c0_22], %122 {strides = array<i32>} : memref<32x16xf32, #tpu.memory_space<vmem>>, vector<4x8xf32>,
    %132 = vector.extract_strided_slice %2 {offsets = [12, 0], sizes = [4, 32], strides = [1, 1]} : vector<32x64xf32> to vector<4x32xf32>
    %cst_23 = arith.constant dense<0.000000e+00> : vector<4x32xf32>
    %133 = tpu.matmul %126, %36, %cst_23 {dimension_numbers = #tpu.dot_dimension_numbers<[1], [0], [0], [1], [0, 0, 1, 1], [], []>} : vector<4x8xf32>, vector<8x32xf32>, vector<4x32xf32> -> vector<4x32xf32>
    %134 = arith.addf %132, %133 : vector<4x32xf32>
    %135 = vector.extract_strided_slice %134 {offsets = [0, 0], sizes = [4, 24], strides = [1, 1]} : vector<4x32xf32> to vector<4x24xf32>
    %cst_24 = arith.constant 0.000000e+00 : f32
    %136 = vector.broadcast %cst_24 : f32 to vector<4x24xf32>
    %137 = arith.subf %136, %135 : vector<4x24xf32>
    %138 = math.exp %137 : vector<4x24xf32>
    %cst_25 = arith.constant 1.000000e+00 : f32
    %139 = vector.broadcast %cst_25 : f32 to vector<4x24xf32>
    %140 = arith.addf %139, %138 : vector<4x24xf32>
    %141 = tpu.reciprocal %140 {approx = true} : vector<4x24xf32> -> vector<4x24xf32>
    %142 = vector.extract_strided_slice %141 {offsets = [0, 0], sizes = [4, 8], strides = [1, 1]} : vector<4x24xf32> to vector<4x8xf32>
    %143 = vector.extract_strided_slice %141 {offsets = [0, 8], sizes = [4, 8], strides = [1, 1]} : vector<4x24xf32> to vector<4x8xf32>
    %144 = vector.extract_strided_slice %141 {offsets = [0, 16], sizes = [4, 8], strides = [1, 1]} : vector<4x24xf32> to vector<4x8xf32>
    %145 = vector.extract_strided_slice %134 {offsets = [0, 24], sizes = [4, 8], strides = [1, 1]} : vector<4x32xf32> to vector<4x8xf32>
    %146 = math.tanh %145 : vector<4x8xf32>
    %147 = arith.mulf %143, %130 : vector<4x8xf32>
    %148 = arith.mulf %142, %146 : vector<4x8xf32>
    %149 = arith.addf %147, %148 : vector<4x8xf32>
    %150 = math.tanh %149 : vector<4x8xf32>
    %151 = arith.mulf %144, %150 : vector<4x8xf32>
    %152 = vector.broadcast %19 : vector<4x1xf32> to vector<4x8xf32>
    %153 = arith.mulf %152, %151 : vector<4x8xf32>
    %154 = arith.subf %151, %126 : vector<4x8xf32>
    %155 = vector.broadcast %19 : vector<4x1xf32> to vector<4x8xf32>
    %156 = arith.mulf %155, %154 : vector<4x8xf32>
    %157 = arith.addf %126, %156 : vector<4x8xf32>
    %158 = arith.subf %149, %130 : vector<4x8xf32>
    %159 = vector.broadcast %19 : vector<4x1xf32> to vector<4x8xf32>
    %160 = arith.mulf %159, %158 : vector<4x8xf32>
    %161 = arith.addf %130, %160 : vector<4x8xf32>
    %c12 = arith.constant 12 : index
    %c0_26 = arith.constant 0 : index
    %162 = vector.load %arg12[%c12, %c0_26] : memref<32x16xf32, #tpu.memory_space<vmem>>, vector<4x8xf32>
    tpu.vector_store %arg12[%c12, %c0_26], %153 {strides = array<i32>} : memref<32x16xf32, #tpu.memory_space<vmem>>, vector<4x8xf32>,
    %163 = vector.extract_strided_slice %2 {offsets = [16, 0], sizes = [4, 32], strides = [1, 1]} : vector<32x64xf32> to vector<4x32xf32>
    %cst_27 = arith.constant dense<0.000000e+00> : vector<4x32xf32>
    %164 = tpu.matmul %157, %36, %cst_27 {dimension_numbers = #tpu.dot_dimension_numbers<[1], [0], [0], [1], [0, 0, 1, 1], [], []>} : vector<4x8xf32>, vector<8x32xf32>, vector<4x32xf32> -> vector<4x32xf32>
    %165 = arith.addf %163, %164 : vector<4x32xf32>
    %166 = vector.extract_strided_slice %165 {offsets = [0, 0], sizes = [4, 24], strides = [1, 1]} : vector<4x32xf32> to vector<4x24xf32>
    %cst_28 = arith.constant 0.000000e+00 : f32
    %167 = vector.broadcast %cst_28 : f32 to vector<4x24xf32>
    %168 = arith.subf %167, %166 : vector<4x24xf32>
    %169 = math.exp %168 : vector<4x24xf32>
    %cst_29 = arith.constant 1.000000e+00 : f32
    %170 = vector.broadcast %cst_29 : f32 to vector<4x24xf32>
    %171 = arith.addf %170, %169 : vector<4x24xf32>
    %172 = tpu.reciprocal %171 {approx = true} : vector<4x24xf32> -> vector<4x24xf32>
    %173 = vector.extract_strided_slice %172 {offsets = [0, 0], sizes = [4, 8], strides = [1, 1]} : vector<4x24xf32> to vector<4x8xf32>
    %174 = vector.extract_strided_slice %172 {offsets = [0, 8], sizes = [4, 8], strides = [1, 1]} : vector<4x24xf32> to vector<4x8xf32>
    %175 = vector.extract_strided_slice %172 {offsets = [0, 16], sizes = [4, 8], strides = [1, 1]} : vector<4x24xf32> to vector<4x8xf32>
    %176 = vector.extract_strided_slice %165 {offsets = [0, 24], sizes = [4, 8], strides = [1, 1]} : vector<4x32xf32> to vector<4x8xf32>
    %177 = math.tanh %176 : vector<4x8xf32>
    %178 = arith.mulf %174, %161 : vector<4x8xf32>
    %179 = arith.mulf %173, %177 : vector<4x8xf32>
    %180 = arith.addf %178, %179 : vector<4x8xf32>
    %181 = math.tanh %180 : vector<4x8xf32>
    %182 = arith.mulf %175, %181 : vector<4x8xf32>
    %183 = vector.broadcast %23 : vector<4x1xf32> to vector<4x8xf32>
    %184 = arith.mulf %183, %182 : vector<4x8xf32>
    %185 = arith.subf %182, %157 : vector<4x8xf32>
    %186 = vector.broadcast %23 : vector<4x1xf32> to vector<4x8xf32>
    %187 = arith.mulf %186, %185 : vector<4x8xf32>
    %188 = arith.addf %157, %187 : vector<4x8xf32>
    %189 = arith.subf %180, %161 : vector<4x8xf32>
    %190 = vector.broadcast %23 : vector<4x1xf32> to vector<4x8xf32>
    %191 = arith.mulf %190, %189 : vector<4x8xf32>
    %192 = arith.addf %161, %191 : vector<4x8xf32>
    %c16 = arith.constant 16 : index
    %c0_30 = arith.constant 0 : index
    %193 = vector.load %arg12[%c16, %c0_30] : memref<32x16xf32, #tpu.memory_space<vmem>>, vector<4x8xf32>
    tpu.vector_store %arg12[%c16, %c0_30], %184 {strides = array<i32>} : memref<32x16xf32, #tpu.memory_space<vmem>>, vector<4x8xf32>,
    %194 = vector.extract_strided_slice %2 {offsets = [20, 0], sizes = [4, 32], strides = [1, 1]} : vector<32x64xf32> to vector<4x32xf32>
    %cst_31 = arith.constant dense<0.000000e+00> : vector<4x32xf32>
    %195 = tpu.matmul %188, %36, %cst_31 {dimension_numbers = #tpu.dot_dimension_numbers<[1], [0], [0], [1], [0, 0, 1, 1], [], []>} : vector<4x8xf32>, vector<8x32xf32>, vector<4x32xf32> -> vector<4x32xf32>
    %196 = arith.addf %194, %195 : vector<4x32xf32>
    %197 = vector.extract_strided_slice %196 {offsets = [0, 0], sizes = [4, 24], strides = [1, 1]} : vector<4x32xf32> to vector<4x24xf32>
    %cst_32 = arith.constant 0.000000e+00 : f32
    %198 = vector.broadcast %cst_32 : f32 to vector<4x24xf32>
    %199 = arith.subf %198, %197 : vector<4x24xf32>
    %200 = math.exp %199 : vector<4x24xf32>
    %cst_33 = arith.constant 1.000000e+00 : f32
    %201 = vector.broadcast %cst_33 : f32 to vector<4x24xf32>
    %202 = arith.addf %201, %200 : vector<4x24xf32>
    %203 = tpu.reciprocal %202 {approx = true} : vector<4x24xf32> -> vector<4x24xf32>
    %204 = vector.extract_strided_slice %203 {offsets = [0, 0], sizes = [4, 8], strides = [1, 1]} : vector<4x24xf32> to vector<4x8xf32>
    %205 = vector.extract_strided_slice %203 {offsets = [0, 8], sizes = [4, 8], strides = [1, 1]} : vector<4x24xf32> to vector<4x8xf32>
    %206 = vector.extract_strided_slice %203 {offsets = [0, 16], sizes = [4, 8], strides = [1, 1]} : vector<4x24xf32> to vector<4x8xf32>
    %207 = vector.extract_strided_slice %196 {offsets = [0, 24], sizes = [4, 8], strides = [1, 1]} : vector<4x32xf32> to vector<4x8xf32>
    %208 = math.tanh %207 : vector<4x8xf32>
    %209 = arith.mulf %205, %192 : vector<4x8xf32>
    %210 = arith.mulf %204, %208 : vector<4x8xf32>
    %211 = arith.addf %209, %210 : vector<4x8xf32>
    %212 = math.tanh %211 : vector<4x8xf32>
    %213 = arith.mulf %206, %212 : vector<4x8xf32>
    %214 = vector.broadcast %27 : vector<4x1xf32> to vector<4x8xf32>
    %215 = arith.mulf %214, %213 : vector<4x8xf32>
    %216 = arith.subf %213, %188 : vector<4x8xf32>
    %217 = vector.broadcast %27 : vector<4x1xf32> to vector<4x8xf32>
    %218 = arith.mulf %217, %216 : vector<4x8xf32>
    %219 = arith.addf %188, %218 : vector<4x8xf32>
    %220 = arith.subf %211, %192 : vector<4x8xf32>
    %221 = vector.broadcast %27 : vector<4x1xf32> to vector<4x8xf32>
    %222 = arith.mulf %221, %220 : vector<4x8xf32>
    %223 = arith.addf %192, %222 : vector<4x8xf32>
    %c20 = arith.constant 20 : index
    %c0_34 = arith.constant 0 : index
    %224 = vector.load %arg12[%c20, %c0_34] : memref<32x16xf32, #tpu.memory_space<vmem>>, vector<4x8xf32>
    tpu.vector_store %arg12[%c20, %c0_34], %215 {strides = array<i32>} : memref<32x16xf32, #tpu.memory_space<vmem>>, vector<4x8xf32>,
    %225 = vector.extract_strided_slice %2 {offsets = [24, 0], sizes = [4, 32], strides = [1, 1]} : vector<32x64xf32> to vector<4x32xf32>
    %cst_35 = arith.constant dense<0.000000e+00> : vector<4x32xf32>
    %226 = tpu.matmul %219, %36, %cst_35 {dimension_numbers = #tpu.dot_dimension_numbers<[1], [0], [0], [1], [0, 0, 1, 1], [], []>} : vector<4x8xf32>, vector<8x32xf32>, vector<4x32xf32> -> vector<4x32xf32>
    %227 = arith.addf %225, %226 : vector<4x32xf32>
    %228 = vector.extract_strided_slice %227 {offsets = [0, 0], sizes = [4, 24], strides = [1, 1]} : vector<4x32xf32> to vector<4x24xf32>
    %cst_36 = arith.constant 0.000000e+00 : f32
    %229 = vector.broadcast %cst_36 : f32 to vector<4x24xf32>
    %230 = arith.subf %229, %228 : vector<4x24xf32>
    %231 = math.exp %230 : vector<4x24xf32>
    %cst_37 = arith.constant 1.000000e+00 : f32
    %232 = vector.broadcast %cst_37 : f32 to vector<4x24xf32>
    %233 = arith.addf %232, %231 : vector<4x24xf32>
    %234 = tpu.reciprocal %233 {approx = true} : vector<4x24xf32> -> vector<4x24xf32>
    %235 = vector.extract_strided_slice %234 {offsets = [0, 0], sizes = [4, 8], strides = [1, 1]} : vector<4x24xf32> to vector<4x8xf32>
    %236 = vector.extract_strided_slice %234 {offsets = [0, 8], sizes = [4, 8], strides = [1, 1]} : vector<4x24xf32> to vector<4x8xf32>
    %237 = vector.extract_strided_slice %234 {offsets = [0, 16], sizes = [4, 8], strides = [1, 1]} : vector<4x24xf32> to vector<4x8xf32>
    %238 = vector.extract_strided_slice %227 {offsets = [0, 24], sizes = [4, 8], strides = [1, 1]} : vector<4x32xf32> to vector<4x8xf32>
    %239 = math.tanh %238 : vector<4x8xf32>
    %240 = arith.mulf %236, %223 : vector<4x8xf32>
    %241 = arith.mulf %235, %239 : vector<4x8xf32>
    %242 = arith.addf %240, %241 : vector<4x8xf32>
    %243 = math.tanh %242 : vector<4x8xf32>
    %244 = arith.mulf %237, %243 : vector<4x8xf32>
    %245 = vector.broadcast %31 : vector<4x1xf32> to vector<4x8xf32>
    %246 = arith.mulf %245, %244 : vector<4x8xf32>
    %247 = arith.subf %244, %219 : vector<4x8xf32>
    %248 = vector.broadcast %31 : vector<4x1xf32> to vector<4x8xf32>
    %249 = arith.mulf %248, %247 : vector<4x8xf32>
    %250 = arith.addf %219, %249 : vector<4x8xf32>
    %251 = arith.subf %242, %223 : vector<4x8xf32>
    %252 = vector.broadcast %31 : vector<4x1xf32> to vector<4x8xf32>
    %253 = arith.mulf %252, %251 : vector<4x8xf32>
    %254 = arith.addf %223, %253 : vector<4x8xf32>
    %c24 = arith.constant 24 : index
    %c0_38 = arith.constant 0 : index
    %255 = vector.load %arg12[%c24, %c0_38] : memref<32x16xf32, #tpu.memory_space<vmem>>, vector<4x8xf32>
    tpu.vector_store %arg12[%c24, %c0_38], %246 {strides = array<i32>} : memref<32x16xf32, #tpu.memory_space<vmem>>, vector<4x8xf32>,
    %256 = vector.extract_strided_slice %2 {offsets = [28, 0], sizes = [4, 32], strides = [1, 1]} : vector<32x64xf32> to vector<4x32xf32>
    %cst_39 = arith.constant dense<0.000000e+00> : vector<4x32xf32>
    %257 = tpu.matmul %250, %36, %cst_39 {dimension_numbers = #tpu.dot_dimension_numbers<[1], [0], [0], [1], [0, 0, 1, 1], [], []>} : vector<4x8xf32>, vector<8x32xf32>, vector<4x32xf32> -> vector<4x32xf32>
    %258 = arith.addf %256, %257 : vector<4x32xf32>
    %259 = vector.extract_strided_slice %258 {offsets = [0, 0], sizes = [4, 24], strides = [1, 1]} : vector<4x32xf32> to vector<4x24xf32>
    %cst_40 = arith.constant 0.000000e+00 : f32
    %260 = vector.broadcast %cst_40 : f32 to vector<4x24xf32>
    %261 = arith.subf %260, %259 : vector<4x24xf32>
    %262 = math.exp %261 : vector<4x24xf32>
    %cst_41 = arith.constant 1.000000e+00 : f32
    %263 = vector.broadcast %cst_41 : f32 to vector<4x24xf32>
    %264 = arith.addf %263, %262 : vector<4x24xf32>
    %265 = tpu.reciprocal %264 {approx = true} : vector<4x24xf32> -> vector<4x24xf32>
    %266 = vector.extract_strided_slice %265 {offsets = [0, 0], sizes = [4, 8], strides = [1, 1]} : vector<4x24xf32> to vector<4x8xf32>
    %267 = vector.extract_strided_slice %265 {offsets = [0, 8], sizes = [4, 8], strides = [1, 1]} : vector<4x24xf32> to vector<4x8xf32>
    %268 = vector.extract_strided_slice %265 {offsets = [0, 16], sizes = [4, 8], strides = [1, 1]} : vector<4x24xf32> to vector<4x8xf32>
    %269 = vector.extract_strided_slice %258 {offsets = [0, 24], sizes = [4, 8], strides = [1, 1]} : vector<4x32xf32> to vector<4x8xf32>
    %270 = math.tanh %269 : vector<4x8xf32>
    %271 = arith.mulf %267, %254 : vector<4x8xf32>
    %272 = arith.mulf %266, %270 : vector<4x8xf32>
    %273 = arith.addf %271, %272 : vector<4x8xf32>
    %274 = math.tanh %273 : vector<4x8xf32>
    %275 = arith.mulf %268, %274 : vector<4x8xf32>
    %276 = vector.broadcast %35 : vector<4x1xf32> to vector<4x8xf32>
    %277 = arith.mulf %276, %275 : vector<4x8xf32>
    %278 = arith.subf %275, %250 : vector<4x8xf32>
    %279 = vector.broadcast %35 : vector<4x1xf32> to vector<4x8xf32>
    %280 = arith.mulf %279, %278 : vector<4x8xf32>
    %281 = arith.addf %250, %280 : vector<4x8xf32>
    %c28 = arith.constant 28 : index
    %c0_42 = arith.constant 0 : index
    %282 = vector.load %arg12[%c28, %c0_42] : memref<32x16xf32, #tpu.memory_space<vmem>>, vector<4x8xf32>
    tpu.vector_store %arg12[%c28, %c0_42], %277 {strides = array<i32>} : memref<32x16xf32, #tpu.memory_space<vmem>>, vector<4x8xf32>,
    %283 = vector.extract_strided_slice %2 {offsets = [28, 32], sizes = [4, 32], strides = [1, 1]} : vector<32x64xf32> to vector<4x32xf32>
    %cst_43 = arith.constant dense<0.000000e+00> : vector<4x32xf32>
    %284 = tpu.matmul %38, %37, %cst_43 {dimension_numbers = #tpu.dot_dimension_numbers<[1], [0], [0], [1], [0, 0, 1, 1], [], []>} : vector<4x8xf32>, vector<8x32xf32>, vector<4x32xf32> -> vector<4x32xf32>
    %285 = arith.addf %283, %284 : vector<4x32xf32>
    %286 = vector.extract_strided_slice %285 {offsets = [0, 0], sizes = [4, 24], strides = [1, 1]} : vector<4x32xf32> to vector<4x24xf32>
    %cst_44 = arith.constant 0.000000e+00 : f32
    %287 = vector.broadcast %cst_44 : f32 to vector<4x24xf32>
    %288 = arith.subf %287, %286 : vector<4x24xf32>
    %289 = math.exp %288 : vector<4x24xf32>
    %cst_45 = arith.constant 1.000000e+00 : f32
    %290 = vector.broadcast %cst_45 : f32 to vector<4x24xf32>
    %291 = arith.addf %290, %289 : vector<4x24xf32>
    %292 = tpu.reciprocal %291 {approx = true} : vector<4x24xf32> -> vector<4x24xf32>
    %293 = vector.extract_strided_slice %292 {offsets = [0, 0], sizes = [4, 8], strides = [1, 1]} : vector<4x24xf32> to vector<4x8xf32>
    %294 = vector.extract_strided_slice %292 {offsets = [0, 8], sizes = [4, 8], strides = [1, 1]} : vector<4x24xf32> to vector<4x8xf32>
    %295 = vector.extract_strided_slice %292 {offsets = [0, 16], sizes = [4, 8], strides = [1, 1]} : vector<4x24xf32> to vector<4x8xf32>
    %296 = vector.extract_strided_slice %285 {offsets = [0, 24], sizes = [4, 8], strides = [1, 1]} : vector<4x32xf32> to vector<4x8xf32>
    %297 = math.tanh %296 : vector<4x8xf32>
    %298 = arith.mulf %294, %38 : vector<4x8xf32>
    %299 = arith.mulf %293, %297 : vector<4x8xf32>
    %300 = arith.addf %298, %299 : vector<4x8xf32>
    %301 = math.tanh %300 : vector<4x8xf32>
    %302 = arith.mulf %295, %301 : vector<4x8xf32>
    %303 = vector.broadcast %35 : vector<4x1xf32> to vector<4x8xf32>
    %304 = arith.mulf %303, %302 : vector<4x8xf32>
    %305 = arith.subf %302, %38 : vector<4x8xf32>
    %306 = vector.broadcast %35 : vector<4x1xf32> to vector<4x8xf32>
    %307 = arith.mulf %306, %305 : vector<4x8xf32>
    %308 = arith.addf %38, %307 : vector<4x8xf32>
    %309 = arith.subf %300, %38 : vector<4x8xf32>
    %310 = vector.broadcast %35 : vector<4x1xf32> to vector<4x8xf32>
    %311 = arith.mulf %310, %309 : vector<4x8xf32>
    %312 = arith.addf %38, %311 : vector<4x8xf32>
    %c28_46 = arith.constant 28 : index
    %c8_47 = arith.constant 8 : index
    %313 = vector.load %arg12[%c28_46, %c8_47] : memref<32x16xf32, #tpu.memory_space<vmem>>, vector<4x8xf32>
    tpu.vector_store %arg12[%c28_46, %c8_47], %304 {strides = array<i32>} : memref<32x16xf32, #tpu.memory_space<vmem>>, vector<4x8xf32>,
    %314 = vector.extract_strided_slice %2 {offsets = [24, 32], sizes = [4, 32], strides = [1, 1]} : vector<32x64xf32> to vector<4x32xf32>
    %cst_48 = arith.constant dense<0.000000e+00> : vector<4x32xf32>
    %315 = tpu.matmul %308, %37, %cst_48 {dimension_numbers = #tpu.dot_dimension_numbers<[1], [0], [0], [1], [0, 0, 1, 1], [], []>} : vector<4x8xf32>, vector<8x32xf32>, vector<4x32xf32> -> vector<4x32xf32>
    %316 = arith.addf %314, %315 : vector<4x32xf32>
    %317 = vector.extract_strided_slice %316 {offsets = [0, 0], sizes = [4, 24], strides = [1, 1]} : vector<4x32xf32> to vector<4x24xf32>
    %cst_49 = arith.constant 0.000000e+00 : f32
    %318 = vector.broadcast %cst_49 : f32 to vector<4x24xf32>
    %319 = arith.subf %318, %317 : vector<4x24xf32>
    %320 = math.exp %319 : vector<4x24xf32>
    %cst_50 = arith.constant 1.000000e+00 : f32
    %321 = vector.broadcast %cst_50 : f32 to vector<4x24xf32>
    %322 = arith.addf %321, %320 : vector<4x24xf32>
    %323 = tpu.reciprocal %322 {approx = true} : vector<4x24xf32> -> vector<4x24xf32>
    %324 = vector.extract_strided_slice %323 {offsets = [0, 0], sizes = [4, 8], strides = [1, 1]} : vector<4x24xf32> to vector<4x8xf32>
    %325 = vector.extract_strided_slice %323 {offsets = [0, 8], sizes = [4, 8], strides = [1, 1]} : vector<4x24xf32> to vector<4x8xf32>
    %326 = vector.extract_strided_slice %323 {offsets = [0, 16], sizes = [4, 8], strides = [1, 1]} : vector<4x24xf32> to vector<4x8xf32>
    %327 = vector.extract_strided_slice %316 {offsets = [0, 24], sizes = [4, 8], strides = [1, 1]} : vector<4x32xf32> to vector<4x8xf32>
    %328 = math.tanh %327 : vector<4x8xf32>
    %329 = arith.mulf %325, %312 : vector<4x8xf32>
    %330 = arith.mulf %324, %328 : vector<4x8xf32>
    %331 = arith.addf %329, %330 : vector<4x8xf32>
    %332 = math.tanh %331 : vector<4x8xf32>
    %333 = arith.mulf %326, %332 : vector<4x8xf32>
    %334 = vector.broadcast %31 : vector<4x1xf32> to vector<4x8xf32>
    %335 = arith.mulf %334, %333 : vector<4x8xf32>
    %336 = arith.subf %333, %308 : vector<4x8xf32>
    %337 = vector.broadcast %31 : vector<4x1xf32> to vector<4x8xf32>
    %338 = arith.mulf %337, %336 : vector<4x8xf32>
    %339 = arith.addf %308, %338 : vector<4x8xf32>
    %340 = arith.subf %331, %312 : vector<4x8xf32>
    %341 = vector.broadcast %31 : vector<4x1xf32> to vector<4x8xf32>
    %342 = arith.mulf %341, %340 : vector<4x8xf32>
    %343 = arith.addf %312, %342 : vector<4x8xf32>
    %c24_51 = arith.constant 24 : index
    %c8_52 = arith.constant 8 : index
    %344 = vector.load %arg12[%c24_51, %c8_52] : memref<32x16xf32, #tpu.memory_space<vmem>>, vector<4x8xf32>
    tpu.vector_store %arg12[%c24_51, %c8_52], %335 {strides = array<i32>} : memref<32x16xf32, #tpu.memory_space<vmem>>, vector<4x8xf32>,
    %345 = vector.extract_strided_slice %2 {offsets = [20, 32], sizes = [4, 32], strides = [1, 1]} : vector<32x64xf32> to vector<4x32xf32>
    %cst_53 = arith.constant dense<0.000000e+00> : vector<4x32xf32>
    %346 = tpu.matmul %339, %37, %cst_53 {dimension_numbers = #tpu.dot_dimension_numbers<[1], [0], [0], [1], [0, 0, 1, 1], [], []>} : vector<4x8xf32>, vector<8x32xf32>, vector<4x32xf32> -> vector<4x32xf32>
    %347 = arith.addf %345, %346 : vector<4x32xf32>
    %348 = vector.extract_strided_slice %347 {offsets = [0, 0], sizes = [4, 24], strides = [1, 1]} : vector<4x32xf32> to vector<4x24xf32>
    %cst_54 = arith.constant 0.000000e+00 : f32
    %349 = vector.broadcast %cst_54 : f32 to vector<4x24xf32>
    %350 = arith.subf %349, %348 : vector<4x24xf32>
    %351 = math.exp %350 : vector<4x24xf32>
    %cst_55 = arith.constant 1.000000e+00 : f32
    %352 = vector.broadcast %cst_55 : f32 to vector<4x24xf32>
    %353 = arith.addf %352, %351 : vector<4x24xf32>
    %354 = tpu.reciprocal %353 {approx = true} : vector<4x24xf32> -> vector<4x24xf32>
    %355 = vector.extract_strided_slice %354 {offsets = [0, 0], sizes = [4, 8], strides = [1, 1]} : vector<4x24xf32> to vector<4x8xf32>
    %356 = vector.extract_strided_slice %354 {offsets = [0, 8], sizes = [4, 8], strides = [1, 1]} : vector<4x24xf32> to vector<4x8xf32>
    %357 = vector.extract_strided_slice %354 {offsets = [0, 16], sizes = [4, 8], strides = [1, 1]} : vector<4x24xf32> to vector<4x8xf32>
    %358 = vector.extract_strided_slice %347 {offsets = [0, 24], sizes = [4, 8], strides = [1, 1]} : vector<4x32xf32> to vector<4x8xf32>
    %359 = math.tanh %358 : vector<4x8xf32>
    %360 = arith.mulf %356, %343 : vector<4x8xf32>
    %361 = arith.mulf %355, %359 : vector<4x8xf32>
    %362 = arith.addf %360, %361 : vector<4x8xf32>
    %363 = math.tanh %362 : vector<4x8xf32>
    %364 = arith.mulf %357, %363 : vector<4x8xf32>
    %365 = vector.broadcast %27 : vector<4x1xf32> to vector<4x8xf32>
    %366 = arith.mulf %365, %364 : vector<4x8xf32>
    %367 = arith.subf %364, %339 : vector<4x8xf32>
    %368 = vector.broadcast %27 : vector<4x1xf32> to vector<4x8xf32>
    %369 = arith.mulf %368, %367 : vector<4x8xf32>
    %370 = arith.addf %339, %369 : vector<4x8xf32>
    %371 = arith.subf %362, %343 : vector<4x8xf32>
    %372 = vector.broadcast %27 : vector<4x1xf32> to vector<4x8xf32>
    %373 = arith.mulf %372, %371 : vector<4x8xf32>
    %374 = arith.addf %343, %373 : vector<4x8xf32>
    %c20_56 = arith.constant 20 : index
    %c8_57 = arith.constant 8 : index
    %375 = vector.load %arg12[%c20_56, %c8_57] : memref<32x16xf32, #tpu.memory_space<vmem>>, vector<4x8xf32>
    tpu.vector_store %arg12[%c20_56, %c8_57], %366 {strides = array<i32>} : memref<32x16xf32, #tpu.memory_space<vmem>>, vector<4x8xf32>,
    %376 = vector.extract_strided_slice %2 {offsets = [16, 32], sizes = [4, 32], strides = [1, 1]} : vector<32x64xf32> to vector<4x32xf32>
    %cst_58 = arith.constant dense<0.000000e+00> : vector<4x32xf32>
    %377 = tpu.matmul %370, %37, %cst_58 {dimension_numbers = #tpu.dot_dimension_numbers<[1], [0], [0], [1], [0, 0, 1, 1], [], []>} : vector<4x8xf32>, vector<8x32xf32>, vector<4x32xf32> -> vector<4x32xf32>
    %378 = arith.addf %376, %377 : vector<4x32xf32>
    %379 = vector.extract_strided_slice %378 {offsets = [0, 0], sizes = [4, 24], strides = [1, 1]} : vector<4x32xf32> to vector<4x24xf32>
    %cst_59 = arith.constant 0.000000e+00 : f32
    %380 = vector.broadcast %cst_59 : f32 to vector<4x24xf32>
    %381 = arith.subf %380, %379 : vector<4x24xf32>
    %382 = math.exp %381 : vector<4x24xf32>
    %cst_60 = arith.constant 1.000000e+00 : f32
    %383 = vector.broadcast %cst_60 : f32 to vector<4x24xf32>
    %384 = arith.addf %383, %382 : vector<4x24xf32>
    %385 = tpu.reciprocal %384 {approx = true} : vector<4x24xf32> -> vector<4x24xf32>
    %386 = vector.extract_strided_slice %385 {offsets = [0, 0], sizes = [4, 8], strides = [1, 1]} : vector<4x24xf32> to vector<4x8xf32>
    %387 = vector.extract_strided_slice %385 {offsets = [0, 8], sizes = [4, 8], strides = [1, 1]} : vector<4x24xf32> to vector<4x8xf32>
    %388 = vector.extract_strided_slice %385 {offsets = [0, 16], sizes = [4, 8], strides = [1, 1]} : vector<4x24xf32> to vector<4x8xf32>
    %389 = vector.extract_strided_slice %378 {offsets = [0, 24], sizes = [4, 8], strides = [1, 1]} : vector<4x32xf32> to vector<4x8xf32>
    %390 = math.tanh %389 : vector<4x8xf32>
    %391 = arith.mulf %387, %374 : vector<4x8xf32>
    %392 = arith.mulf %386, %390 : vector<4x8xf32>
    %393 = arith.addf %391, %392 : vector<4x8xf32>
    %394 = math.tanh %393 : vector<4x8xf32>
    %395 = arith.mulf %388, %394 : vector<4x8xf32>
    %396 = vector.broadcast %23 : vector<4x1xf32> to vector<4x8xf32>
    %397 = arith.mulf %396, %395 : vector<4x8xf32>
    %398 = arith.subf %395, %370 : vector<4x8xf32>
    %399 = vector.broadcast %23 : vector<4x1xf32> to vector<4x8xf32>
    %400 = arith.mulf %399, %398 : vector<4x8xf32>
    %401 = arith.addf %370, %400 : vector<4x8xf32>
    %402 = arith.subf %393, %374 : vector<4x8xf32>
    %403 = vector.broadcast %23 : vector<4x1xf32> to vector<4x8xf32>
    %404 = arith.mulf %403, %402 : vector<4x8xf32>
    %405 = arith.addf %374, %404 : vector<4x8xf32>
    %c16_61 = arith.constant 16 : index
    %c8_62 = arith.constant 8 : index
    %406 = vector.load %arg12[%c16_61, %c8_62] : memref<32x16xf32, #tpu.memory_space<vmem>>, vector<4x8xf32>
    tpu.vector_store %arg12[%c16_61, %c8_62], %397 {strides = array<i32>} : memref<32x16xf32, #tpu.memory_space<vmem>>, vector<4x8xf32>,
    %407 = vector.extract_strided_slice %2 {offsets = [12, 32], sizes = [4, 32], strides = [1, 1]} : vector<32x64xf32> to vector<4x32xf32>
    %cst_63 = arith.constant dense<0.000000e+00> : vector<4x32xf32>
    %408 = tpu.matmul %401, %37, %cst_63 {dimension_numbers = #tpu.dot_dimension_numbers<[1], [0], [0], [1], [0, 0, 1, 1], [], []>} : vector<4x8xf32>, vector<8x32xf32>, vector<4x32xf32> -> vector<4x32xf32>
    %409 = arith.addf %407, %408 : vector<4x32xf32>
    %410 = vector.extract_strided_slice %409 {offsets = [0, 0], sizes = [4, 24], strides = [1, 1]} : vector<4x32xf32> to vector<4x24xf32>
    %cst_64 = arith.constant 0.000000e+00 : f32
    %411 = vector.broadcast %cst_64 : f32 to vector<4x24xf32>
    %412 = arith.subf %411, %410 : vector<4x24xf32>
    %413 = math.exp %412 : vector<4x24xf32>
    %cst_65 = arith.constant 1.000000e+00 : f32
    %414 = vector.broadcast %cst_65 : f32 to vector<4x24xf32>
    %415 = arith.addf %414, %413 : vector<4x24xf32>
    %416 = tpu.reciprocal %415 {approx = true} : vector<4x24xf32> -> vector<4x24xf32>
    %417 = vector.extract_strided_slice %416 {offsets = [0, 0], sizes = [4, 8], strides = [1, 1]} : vector<4x24xf32> to vector<4x8xf32>
    %418 = vector.extract_strided_slice %416 {offsets = [0, 8], sizes = [4, 8], strides = [1, 1]} : vector<4x24xf32> to vector<4x8xf32>
    %419 = vector.extract_strided_slice %416 {offsets = [0, 16], sizes = [4, 8], strides = [1, 1]} : vector<4x24xf32> to vector<4x8xf32>
    %420 = vector.extract_strided_slice %409 {offsets = [0, 24], sizes = [4, 8], strides = [1, 1]} : vector<4x32xf32> to vector<4x8xf32>
    %421 = math.tanh %420 : vector<4x8xf32>
    %422 = arith.mulf %418, %405 : vector<4x8xf32>
    %423 = arith.mulf %417, %421 : vector<4x8xf32>
    %424 = arith.addf %422, %423 : vector<4x8xf32>
    %425 = math.tanh %424 : vector<4x8xf32>
    %426 = arith.mulf %419, %425 : vector<4x8xf32>
    %427 = vector.broadcast %19 : vector<4x1xf32> to vector<4x8xf32>
    %428 = arith.mulf %427, %426 : vector<4x8xf32>
    %429 = arith.subf %426, %401 : vector<4x8xf32>
    %430 = vector.broadcast %19 : vector<4x1xf32> to vector<4x8xf32>
    %431 = arith.mulf %430, %429 : vector<4x8xf32>
    %432 = arith.addf %401, %431 : vector<4x8xf32>
    %433 = arith.subf %424, %405 : vector<4x8xf32>
    %434 = vector.broadcast %19 : vector<4x1xf32> to vector<4x8xf32>
    %435 = arith.mulf %434, %433 : vector<4x8xf32>
    %436 = arith.addf %405, %435 : vector<4x8xf32>
    %c12_66 = arith.constant 12 : index
    %c8_67 = arith.constant 8 : index
    %437 = vector.load %arg12[%c12_66, %c8_67] : memref<32x16xf32, #tpu.memory_space<vmem>>, vector<4x8xf32>
    tpu.vector_store %arg12[%c12_66, %c8_67], %428 {strides = array<i32>} : memref<32x16xf32, #tpu.memory_space<vmem>>, vector<4x8xf32>,
    %438 = vector.extract_strided_slice %2 {offsets = [8, 32], sizes = [4, 32], strides = [1, 1]} : vector<32x64xf32> to vector<4x32xf32>
    %cst_68 = arith.constant dense<0.000000e+00> : vector<4x32xf32>
    %439 = tpu.matmul %432, %37, %cst_68 {dimension_numbers = #tpu.dot_dimension_numbers<[1], [0], [0], [1], [0, 0, 1, 1], [], []>} : vector<4x8xf32>, vector<8x32xf32>, vector<4x32xf32> -> vector<4x32xf32>
    %440 = arith.addf %438, %439 : vector<4x32xf32>
    %441 = vector.extract_strided_slice %440 {offsets = [0, 0], sizes = [4, 24], strides = [1, 1]} : vector<4x32xf32> to vector<4x24xf32>
    %cst_69 = arith.constant 0.000000e+00 : f32
    %442 = vector.broadcast %cst_69 : f32 to vector<4x24xf32>
    %443 = arith.subf %442, %441 : vector<4x24xf32>
    %444 = math.exp %443 : vector<4x24xf32>
    %cst_70 = arith.constant 1.000000e+00 : f32
    %445 = vector.broadcast %cst_70 : f32 to vector<4x24xf32>
    %446 = arith.addf %445, %444 : vector<4x24xf32>
    %447 = tpu.reciprocal %446 {approx = true} : vector<4x24xf32> -> vector<4x24xf32>
    %448 = vector.extract_strided_slice %447 {offsets = [0, 0], sizes = [4, 8], strides = [1, 1]} : vector<4x24xf32> to vector<4x8xf32>
    %449 = vector.extract_strided_slice %447 {offsets = [0, 8], sizes = [4, 8], strides = [1, 1]} : vector<4x24xf32> to vector<4x8xf32>
    %450 = vector.extract_strided_slice %447 {offsets = [0, 16], sizes = [4, 8], strides = [1, 1]} : vector<4x24xf32> to vector<4x8xf32>
    %451 = vector.extract_strided_slice %440 {offsets = [0, 24], sizes = [4, 8], strides = [1, 1]} : vector<4x32xf32> to vector<4x8xf32>
    %452 = math.tanh %451 : vector<4x8xf32>
    %453 = arith.mulf %449, %436 : vector<4x8xf32>
    %454 = arith.mulf %448, %452 : vector<4x8xf32>
    %455 = arith.addf %453, %454 : vector<4x8xf32>
    %456 = math.tanh %455 : vector<4x8xf32>
    %457 = arith.mulf %450, %456 : vector<4x8xf32>
    %458 = vector.broadcast %15 : vector<4x1xf32> to vector<4x8xf32>
    %459 = arith.mulf %458, %457 : vector<4x8xf32>
    %460 = arith.subf %457, %432 : vector<4x8xf32>
    %461 = vector.broadcast %15 : vector<4x1xf32> to vector<4x8xf32>
    %462 = arith.mulf %461, %460 : vector<4x8xf32>
    %463 = arith.addf %432, %462 : vector<4x8xf32>
    %464 = arith.subf %455, %436 : vector<4x8xf32>
    %465 = vector.broadcast %15 : vector<4x1xf32> to vector<4x8xf32>
    %466 = arith.mulf %465, %464 : vector<4x8xf32>
    %467 = arith.addf %436, %466 : vector<4x8xf32>
    %c8_71 = arith.constant 8 : index
    %c8_72 = arith.constant 8 : index
    %468 = vector.load %arg12[%c8_71, %c8_72] : memref<32x16xf32, #tpu.memory_space<vmem>>, vector<4x8xf32>
    tpu.vector_store %arg12[%c8_71, %c8_72], %459 {strides = array<i32>} : memref<32x16xf32, #tpu.memory_space<vmem>>, vector<4x8xf32>,
    %469 = vector.extract_strided_slice %2 {offsets = [4, 32], sizes = [4, 32], strides = [1, 1]} : vector<32x64xf32> to vector<4x32xf32>
    %cst_73 = arith.constant dense<0.000000e+00> : vector<4x32xf32>
    %470 = tpu.matmul %463, %37, %cst_73 {dimension_numbers = #tpu.dot_dimension_numbers<[1], [0], [0], [1], [0, 0, 1, 1], [], []>} : vector<4x8xf32>, vector<8x32xf32>, vector<4x32xf32> -> vector<4x32xf32>
    %471 = arith.addf %469, %470 : vector<4x32xf32>
    %472 = vector.extract_strided_slice %471 {offsets = [0, 0], sizes = [4, 24], strides = [1, 1]} : vector<4x32xf32> to vector<4x24xf32>
    %cst_74 = arith.constant 0.000000e+00 : f32
    %473 = vector.broadcast %cst_74 : f32 to vector<4x24xf32>
    %474 = arith.subf %473, %472 : vector<4x24xf32>
    %475 = math.exp %474 : vector<4x24xf32>
    %cst_75 = arith.constant 1.000000e+00 : f32
    %476 = vector.broadcast %cst_75 : f32 to vector<4x24xf32>
    %477 = arith.addf %476, %475 : vector<4x24xf32>
    %478 = tpu.reciprocal %477 {approx = true} : vector<4x24xf32> -> vector<4x24xf32>
    %479 = vector.extract_strided_slice %478 {offsets = [0, 0], sizes = [4, 8], strides = [1, 1]} : vector<4x24xf32> to vector<4x8xf32>
    %480 = vector.extract_strided_slice %478 {offsets = [0, 8], sizes = [4, 8], strides = [1, 1]} : vector<4x24xf32> to vector<4x8xf32>
    %481 = vector.extract_strided_slice %478 {offsets = [0, 16], sizes = [4, 8], strides = [1, 1]} : vector<4x24xf32> to vector<4x8xf32>
    %482 = vector.extract_strided_slice %471 {offsets = [0, 24], sizes = [4, 8], strides = [1, 1]} : vector<4x32xf32> to vector<4x8xf32>
    %483 = math.tanh %482 : vector<4x8xf32>
    %484 = arith.mulf %480, %467 : vector<4x8xf32>
    %485 = arith.mulf %479, %483 : vector<4x8xf32>
    %486 = arith.addf %484, %485 : vector<4x8xf32>
    %487 = math.tanh %486 : vector<4x8xf32>
    %488 = arith.mulf %481, %487 : vector<4x8xf32>
    %489 = vector.broadcast %11 : vector<4x1xf32> to vector<4x8xf32>
    %490 = arith.mulf %489, %488 : vector<4x8xf32>
    %491 = arith.subf %488, %463 : vector<4x8xf32>
    %492 = vector.broadcast %11 : vector<4x1xf32> to vector<4x8xf32>
    %493 = arith.mulf %492, %491 : vector<4x8xf32>
    %494 = arith.addf %463, %493 : vector<4x8xf32>
    %495 = arith.subf %486, %467 : vector<4x8xf32>
    %496 = vector.broadcast %11 : vector<4x1xf32> to vector<4x8xf32>
    %497 = arith.mulf %496, %495 : vector<4x8xf32>
    %498 = arith.addf %467, %497 : vector<4x8xf32>
    %c4_76 = arith.constant 4 : index
    %c8_77 = arith.constant 8 : index
    %499 = vector.load %arg12[%c4_76, %c8_77] : memref<32x16xf32, #tpu.memory_space<vmem>>, vector<4x8xf32>
    tpu.vector_store %arg12[%c4_76, %c8_77], %490 {strides = array<i32>} : memref<32x16xf32, #tpu.memory_space<vmem>>, vector<4x8xf32>,
    %500 = vector.extract_strided_slice %2 {offsets = [0, 32], sizes = [4, 32], strides = [1, 1]} : vector<32x64xf32> to vector<4x32xf32>
    %cst_78 = arith.constant dense<0.000000e+00> : vector<4x32xf32>
    %501 = tpu.matmul %494, %37, %cst_78 {dimension_numbers = #tpu.dot_dimension_numbers<[1], [0], [0], [1], [0, 0, 1, 1], [], []>} : vector<4x8xf32>, vector<8x32xf32>, vector<4x32xf32> -> vector<4x32xf32>
    %502 = arith.addf %500, %501 : vector<4x32xf32>
    %503 = vector.extract_strided_slice %502 {offsets = [0, 0], sizes = [4, 24], strides = [1, 1]} : vector<4x32xf32> to vector<4x24xf32>
    %cst_79 = arith.constant 0.000000e+00 : f32
    %504 = vector.broadcast %cst_79 : f32 to vector<4x24xf32>
    %505 = arith.subf %504, %503 : vector<4x24xf32>
    %506 = math.exp %505 : vector<4x24xf32>
    %cst_80 = arith.constant 1.000000e+00 : f32
    %507 = vector.broadcast %cst_80 : f32 to vector<4x24xf32>
    %508 = arith.addf %507, %506 : vector<4x24xf32>
    %509 = tpu.reciprocal %508 {approx = true} : vector<4x24xf32> -> vector<4x24xf32>
    %510 = vector.extract_strided_slice %509 {offsets = [0, 0], sizes = [4, 8], strides = [1, 1]} : vector<4x24xf32> to vector<4x8xf32>
    %511 = vector.extract_strided_slice %509 {offsets = [0, 8], sizes = [4, 8], strides = [1, 1]} : vector<4x24xf32> to vector<4x8xf32>
    %512 = vector.extract_strided_slice %509 {offsets = [0, 16], sizes = [4, 8], strides = [1, 1]} : vector<4x24xf32> to vector<4x8xf32>
    %513 = vector.extract_strided_slice %502 {offsets = [0, 24], sizes = [4, 8], strides = [1, 1]} : vector<4x32xf32> to vector<4x8xf32>
    %514 = math.tanh %513 : vector<4x8xf32>
    %515 = arith.mulf %511, %498 : vector<4x8xf32>
    %516 = arith.mulf %510, %514 : vector<4x8xf32>
    %517 = arith.addf %515, %516 : vector<4x8xf32>
    %518 = math.tanh %517 : vector<4x8xf32>
    %519 = arith.mulf %512, %518 : vector<4x8xf32>
    %520 = vector.broadcast %7 : vector<4x1xf32> to vector<4x8xf32>
    %521 = arith.mulf %520, %519 : vector<4x8xf32>
    %522 = arith.subf %519, %494 : vector<4x8xf32>
    %523 = vector.broadcast %7 : vector<4x1xf32> to vector<4x8xf32>
    %524 = arith.mulf %523, %522 : vector<4x8xf32>
    %525 = arith.addf %494, %524 : vector<4x8xf32>
    %c0_81 = arith.constant 0 : index
    %c8_82 = arith.constant 8 : index
    %526 = vector.load %arg12[%c0_81, %c8_82] : memref<32x16xf32, #tpu.memory_space<vmem>>, vector<4x8xf32>
    tpu.vector_store %arg12[%c0_81, %c8_82], %521 {strides = array<i32>} : memref<32x16xf32, #tpu.memory_space<vmem>>, vector<4x8xf32>,
    %c0_83 = arith.constant 0 : index
    %c0_84 = arith.constant 0 : index
    %527 = vector.load %arg12[%c0_83, %c0_84] : memref<32x16xf32, #tpu.memory_space<vmem>>, vector<32x16xf32>
    %c0_85 = arith.constant 0 : index
    %c0_86 = arith.constant 0 : index
    %528 = vector.load %arg6[%c0_85, %c0_86] : memref<16x24xf32, #tpu.memory_space<vmem>>, vector<16x24xf32>
    %cst_87 = arith.constant dense<0.000000e+00> : vector<32x24xf32>
    %529 = tpu.matmul %527, %528, %cst_87 {dimension_numbers = #tpu.dot_dimension_numbers<[1], [0], [0], [1], [0, 0, 1, 1], [], []>} : vector<32x16xf32>, vector<16x24xf32>, vector<32x24xf32> -> vector<32x24xf32>
    %530 = vector.extract_strided_slice %529 {offsets = [0, 8], sizes = [4, 8], strides = [1, 1]} : vector<32x24xf32> to vector<4x8xf32>
    %531 = vector.extract_strided_slice %529 {offsets = [4, 16], sizes = [4, 8], strides = [1, 1]} : vector<32x24xf32> to vector<4x8xf32>
    %532 = arith.addf %530, %531 : vector<4x8xf32>
    %533 = math.tanh %532 : vector<4x8xf32>
    %534 = vector.extract_strided_slice %529 {offsets = [0, 0], sizes = [4, 8], strides = [1, 1]} : vector<32x24xf32> to vector<4x8xf32>
    %535 = vector.extract_strided_slice %529 {offsets = [4, 8], sizes = [4, 8], strides = [1, 1]} : vector<32x24xf32> to vector<4x8xf32>
    %536 = arith.addf %534, %535 : vector<4x8xf32>
    %537 = vector.extract_strided_slice %529 {offsets = [8, 16], sizes = [4, 8], strides = [1, 1]} : vector<32x24xf32> to vector<4x8xf32>
    %538 = arith.addf %536, %537 : vector<4x8xf32>
    %539 = math.tanh %538 : vector<4x8xf32>
    %540 = arith.maximumf %533, %539 : vector<4x8xf32>
    %541 = vector.extract_strided_slice %529 {offsets = [4, 0], sizes = [4, 8], strides = [1, 1]} : vector<32x24xf32> to vector<4x8xf32>
    %542 = vector.extract_strided_slice %529 {offsets = [8, 8], sizes = [4, 8], strides = [1, 1]} : vector<32x24xf32> to vector<4x8xf32>
    %543 = arith.addf %541, %542 : vector<4x8xf32>
    %544 = vector.extract_strided_slice %529 {offsets = [12, 16], sizes = [4, 8], strides = [1, 1]} : vector<32x24xf32> to vector<4x8xf32>
    %545 = arith.addf %543, %544 : vector<4x8xf32>
    %546 = math.tanh %545 : vector<4x8xf32>
    %547 = arith.maximumf %540, %546 : vector<4x8xf32>
    %548 = vector.extract_strided_slice %529 {offsets = [8, 0], sizes = [4, 8], strides = [1, 1]} : vector<32x24xf32> to vector<4x8xf32>
    %549 = vector.extract_strided_slice %529 {offsets = [12, 8], sizes = [4, 8], strides = [1, 1]} : vector<32x24xf32> to vector<4x8xf32>
    %550 = arith.addf %548, %549 : vector<4x8xf32>
    %551 = vector.extract_strided_slice %529 {offsets = [16, 16], sizes = [4, 8], strides = [1, 1]} : vector<32x24xf32> to vector<4x8xf32>
    %552 = arith.addf %550, %551 : vector<4x8xf32>
    %553 = math.tanh %552 : vector<4x8xf32>
    %554 = arith.maximumf %547, %553 : vector<4x8xf32>
    %555 = vector.extract_strided_slice %529 {offsets = [12, 0], sizes = [4, 8], strides = [1, 1]} : vector<32x24xf32> to vector<4x8xf32>
    %556 = vector.extract_strided_slice %529 {offsets = [16, 8], sizes = [4, 8], strides = [1, 1]} : vector<32x24xf32> to vector<4x8xf32>
    %557 = arith.addf %555, %556 : vector<4x8xf32>
    %558 = vector.extract_strided_slice %529 {offsets = [20, 16], sizes = [4, 8], strides = [1, 1]} : vector<32x24xf32> to vector<4x8xf32>
    %559 = arith.addf %557, %558 : vector<4x8xf32>
    %560 = math.tanh %559 : vector<4x8xf32>
    %561 = arith.maximumf %554, %560 : vector<4x8xf32>
    %562 = vector.extract_strided_slice %529 {offsets = [16, 0], sizes = [4, 8], strides = [1, 1]} : vector<32x24xf32> to vector<4x8xf32>
    %563 = vector.extract_strided_slice %529 {offsets = [20, 8], sizes = [4, 8], strides = [1, 1]} : vector<32x24xf32> to vector<4x8xf32>
    %564 = arith.addf %562, %563 : vector<4x8xf32>
    %565 = vector.extract_strided_slice %529 {offsets = [24, 16], sizes = [4, 8], strides = [1, 1]} : vector<32x24xf32> to vector<4x8xf32>
    %566 = arith.addf %564, %565 : vector<4x8xf32>
    %567 = math.tanh %566 : vector<4x8xf32>
    %568 = arith.maximumf %561, %567 : vector<4x8xf32>
    %569 = vector.extract_strided_slice %529 {offsets = [20, 0], sizes = [4, 8], strides = [1, 1]} : vector<32x24xf32> to vector<4x8xf32>
    %570 = vector.extract_strided_slice %529 {offsets = [24, 8], sizes = [4, 8], strides = [1, 1]} : vector<32x24xf32> to vector<4x8xf32>
    %571 = arith.addf %569, %570 : vector<4x8xf32>
    %572 = vector.extract_strided_slice %529 {offsets = [28, 16], sizes = [4, 8], strides = [1, 1]} : vector<32x24xf32> to vector<4x8xf32>
    %573 = arith.addf %571, %572 : vector<4x8xf32>
    %574 = math.tanh %573 : vector<4x8xf32>
    %575 = arith.maximumf %568, %574 : vector<4x8xf32>
    %576 = vector.extract_strided_slice %529 {offsets = [24, 0], sizes = [4, 8], strides = [1, 1]} : vector<32x24xf32> to vector<4x8xf32>
    %577 = vector.extract_strided_slice %529 {offsets = [28, 8], sizes = [4, 8], strides = [1, 1]} : vector<32x24xf32> to vector<4x8xf32>
    %578 = arith.addf %576, %577 : vector<4x8xf32>
    %579 = math.tanh %578 : vector<4x8xf32>
    %580 = arith.maximumf %575, %579 : vector<4x8xf32>
    %581 = vector.extract_strided_slice %281 {offsets = [0, 0], sizes = [2, 8], strides = [1, 1]} : vector<4x8xf32> to vector<2x8xf32>
    %582 = vector.extract_strided_slice %281 {offsets = [2, 0], sizes = [2, 8], strides = [1, 1]} : vector<4x8xf32> to vector<2x8xf32>
    %583 = vector.extract_strided_slice %525 {offsets = [0, 0], sizes = [2, 8], strides = [1, 1]} : vector<4x8xf32> to vector<2x8xf32>
    %584 = vector.extract_strided_slice %525 {offsets = [2, 0], sizes = [2, 8], strides = [1, 1]} : vector<4x8xf32> to vector<2x8xf32>
    %585 = vector.extract_strided_slice %580 {offsets = [0, 0], sizes = [2, 8], strides = [1, 1]} : vector<4x8xf32> to vector<2x8xf32>
    %586 = vector.extract_strided_slice %580 {offsets = [2, 0], sizes = [2, 8], strides = [1, 1]} : vector<4x8xf32> to vector<2x8xf32>
    %587 = arith.subf %581, %582 : vector<2x8xf32>
    %588 = math.absf %587 : vector<2x8xf32>
    %589 = arith.subf %583, %584 : vector<2x8xf32>
    %590 = math.absf %589 : vector<2x8xf32>
    %591 = arith.maximumf %581, %582 : vector<2x8xf32>
    %592 = arith.maximumf %583, %584 : vector<2x8xf32>
    %593 = arith.mulf %581, %582 : vector<2x8xf32>
    %594 = arith.mulf %583, %584 : vector<2x8xf32>
    %595 = tpu.concatenate %588, %590, %591, %592, %593, %594, %585, %586 in 1 : vector<2x8xf32>, vector<2x8xf32>, vector<2x8xf32>, vector<2x8xf32>, vector<2x8xf32>, vector<2x8xf32>, vector<2x8xf32>, vector<2x8xf32> -> vector<2x64xf32>
    %c0_88 = arith.constant 0 : index
    %c0_89 = arith.constant 0 : index
    %596 = vector.load %arg7[%c0_88, %c0_89] : memref<64x80xf32, #tpu.memory_space<vmem>>, vector<64x80xf32>
    %cst_90 = arith.constant dense<0.000000e+00> : vector<2x80xf32>
    %597 = tpu.matmul %595, %596, %cst_90 {dimension_numbers = #tpu.dot_dimension_numbers<[1], [0], [0], [1], [0, 0, 1, 1], [], []>} : vector<2x64xf32>, vector<64x80xf32>, vector<2x80xf32> -> vector<2x80xf32>
    %c0_91 = arith.constant 0 : index
    %c0_92 = arith.constant 0 : index
    %598 = vector.load %arg8[%c0_91, %c0_92] : memref<1x80xf32, #tpu.memory_space<vmem>>, vector<1x80xf32>
    %599 = vector.broadcast %598 : vector<1x80xf32> to vector<2x80xf32>
    %600 = arith.addf %597, %599 : vector<2x80xf32>
    %601 = vector.extract_strided_slice %600 {offsets = [0, 0], sizes = [2, 32], strides = [1, 1]} : vector<2x80xf32> to vector<2x32xf32>
    %cst_93 = arith.constant 0.000000e+00 : f32
    %602 = vector.broadcast %cst_93 : f32 to vector<2x32xf32>
    %603 = arith.maximumf %601, %602 : vector<2x32xf32>
    %604 = vector.extract_strided_slice %600 {offsets = [0, 32], sizes = [2, 48], strides = [1, 1]} : vector<2x80xf32> to vector<2x48xf32>
    %cst_94 = arith.constant 0.000000e+00 : f32
    %605 = vector.broadcast %cst_94 : f32 to vector<2x48xf32>
    %606 = arith.subf %605, %604 : vector<2x48xf32>
    %607 = math.exp %606 : vector<2x48xf32>
    %cst_95 = arith.constant 1.000000e+00 : f32
    %608 = vector.broadcast %cst_95 : f32 to vector<2x48xf32>
    %609 = arith.addf %608, %607 : vector<2x48xf32>
    %610 = tpu.reciprocal %609 {approx = true} : vector<2x48xf32> -> vector<2x48xf32>
    %611 = tpu.concatenate %603, %610 in 1 : vector<2x32xf32>, vector<2x48xf32> -> vector<2x80xf32>
    %c0_96 = arith.constant 0 : index
    %c0_97 = arith.constant 0 : index
    %612 = vector.load %arg9[%c0_96, %c0_97] : memref<80x1xf32, #tpu.memory_space<vmem>>, vector<80x1xf32>
    %cst_98 = arith.constant dense<0.000000e+00> : vector<2x1xf32>
    %613 = tpu.matmul %611, %612, %cst_98 {dimension_numbers = #tpu.dot_dimension_numbers<[1], [0], [0], [1], [0, 0, 1, 1], [], []>} : vector<2x80xf32>, vector<80x1xf32>, vector<2x1xf32> -> vector<2x1xf32>
    %c0_99 = arith.constant 0 : index
    %c0_100 = arith.constant 0 : index
    %614 = vector.load %arg10[%c0_99, %c0_100] : memref<1x1xf32, #tpu.memory_space<vmem>>, vector<1x1xf32>
    %615 = vector.broadcast %614 : vector<1x1xf32> to vector<2x1xf32>
    %616 = arith.addf %613, %615 : vector<2x1xf32>
    %cst_101 = arith.constant 0.000000e+00 : f32
    %617 = vector.broadcast %cst_101 : f32 to vector<2x1xf32>
    %618 = arith.subf %617, %616 : vector<2x1xf32>
    %619 = math.exp %618 : vector<2x1xf32>
    %cst_102 = arith.constant 1.000000e+00 : f32
    %620 = vector.broadcast %cst_102 : f32 to vector<2x1xf32>
    %621 = arith.addf %620, %619 : vector<2x1xf32>
    %cst_103 = arith.constant 1.000000e+00 : f32
    %622 = vector.broadcast %cst_103 : f32 to vector<2x1xf32>
    %623 = arith.divf %622, %621 : vector<2x1xf32>
    %c0_104 = arith.constant 0 : index
    %c0_105 = arith.constant 0 : index
    %624 = vector.load %arg11[%c0_104, %c0_105] : memref<2x1xf32, #tpu.memory_space<vmem>>, vector<2x1xf32>
    tpu.vector_store %arg11[%c0_104, %c0_105], %623 {strides = array<i32>} : memref<2x1xf32, #tpu.memory_space<vmem>>, vector<2x1xf32>,
    return
  }
  func.func @transform_0(%arg0: i32) -> (i32, i32) {
    %c0_i32 = arith.constant 0 : i32
    %c0_i32_0 = arith.constant 0 : i32
    %c0_i32_1 = arith.constant 0 : i32
    return %c0_i32, %c0_i32_0 : i32, i32
  }
  func.func @transform_1(%arg0: i32) -> (i32, i32) {
    %c0_i32 = arith.constant 0 : i32
    %c0_i32_0 = arith.constant 0 : i32
    %c0_i32_1 = arith.constant 0 : i32
    return %c0_i32, %c0_i32_0 : i32, i32
  }
  func.func @transform_2(%arg0: i32) -> (i32, i32) {
    %c0_i32 = arith.constant 0 : i32
    %c0_i32_0 = arith.constant 0 : i32
    %c0_i32_1 = arith.constant 0 : i32
    return %c0_i32, %c0_i32_0 : i32, i32
  }
  func.func @transform_3(%arg0: i32) -> (i32, i32) {
    %c0_i32 = arith.constant 0 : i32
    %c0_i32_0 = arith.constant 0 : i32
    %c0_i32_1 = arith.constant 0 : i32
    return %c0_i32, %c0_i32_0 : i32, i32
  }
  func.func @transform_4(%arg0: i32) -> (i32, i32) {
    %c0_i32 = arith.constant 0 : i32
    %c0_i32_0 = arith.constant 0 : i32
    %c0_i32_1 = arith.constant 0 : i32
    return %c0_i32, %c0_i32_0 : i32, i32
  }
  func.func @transform_5(%arg0: i32) -> (i32, i32) {
    %c0_i32 = arith.constant 0 : i32
    %c0_i32_0 = arith.constant 0 : i32
    %c0_i32_1 = arith.constant 0 : i32
    return %c0_i32, %c0_i32_0 : i32, i32
  }
  func.func @transform_6(%arg0: i32) -> (i32, i32) {
    %c0_i32 = arith.constant 0 : i32
    %c0_i32_0 = arith.constant 0 : i32
    %c0_i32_1 = arith.constant 0 : i32
    return %c0_i32, %c0_i32_0 : i32, i32
  }
  func.func @transform_7(%arg0: i32) -> (i32, i32) {
    %c0_i32 = arith.constant 0 : i32
    %c0_i32_0 = arith.constant 0 : i32
    %c0_i32_1 = arith.constant 0 : i32
    return %c0_i32, %c0_i32_0 : i32, i32
  }
  func.func @transform_8(%arg0: i32) -> (i32, i32) {
    %c0_i32 = arith.constant 0 : i32
    %c0_i32_0 = arith.constant 0 : i32
    %c0_i32_1 = arith.constant 0 : i32
    return %c0_i32, %c0_i32_0 : i32, i32
  }
  func.func @transform_9(%arg0: i32) -> (i32, i32) {
    %c0_i32 = arith.constant 0 : i32
    %c0_i32_0 = arith.constant 0 : i32
    %c0_i32_1 = arith.constant 0 : i32
    return %c0_i32, %c0_i32_0 : i32, i32
  }
  func.func @transform_10(%arg0: i32) -> (i32, i32) {
    %c0_i32 = arith.constant 0 : i32
    %c0_i32_0 = arith.constant 0 : i32
    %c0_i32_1 = arith.constant 0 : i32
    return %c0_i32, %c0_i32_0 : i32, i32
  }
}

</mosaic_0001>

<bundles_post_ra>
// kernel: tpu_custom_call.1
= control target key start
LH: loop header
LB: loop body
LE: loop exit
PB: predicated region body
PF: predicated region fallthrough
CT: control target
= control target key end

     0   :  { %vm42_vm0 = vcmask 64512   ;;  %v3109_v5 = vmov 0.0   ;;  %vm3110_vm1 = vmmov 0   ;;  %v3111_v7 = vmov 0   ;;  %s3113_s24 = smov 8   ;;  %s3114_s25 = smov 112   ;;  %s3748_s2 = inlined_call_operand.vmem [shape: f32[8,64], index: 2, kind: input, shape index: {}]   ;;  %s3749_s0 = inlined_call_operand.vmem [shape: f32[32,8], index: 0, kind: input, shape index: {}]   ;;  %s3750_s3 = inlined_call_operand.vmem [shape: f32[8,32], index: 3, kind: input, shape index: {}]   ;;  %s3751_s1 = inlined_call_operand.vmem [shape: s32[4,1], index: 1, kind: input, shape index: {}]   ;;  %s3752_s4 = inlined_call_operand.vmem [shape: f32[8,32], index: 4, kind: input, shape index: {}]   ;;  %s3753_s5 = inlined_call_operand.vmem [shape: f32[16,24], index: 5, kind: input, shape index: {}]   ;;  %s3754_s6 = inlined_call_operand.vmem [shape: f32[64,80], index: 6, kind: input, shape index: {}]   ;;  %s3755_s8 = inlined_call_operand.vmem [shape: f32[80,1], index: 8, kind: input, shape index: {}]   ;;  %s3756_s9 = inlined_call_operand.<no memory space> [shape: f32[1,1], index: 9, kind: input, shape index: {}]   ;;  %s3757_s7 = inlined_call_operand.vmem [shape: f32[1,80], index: 7, kind: input, shape index: {}]   ;;  %s3758_s10 = inlined_call_operand.vmem [shape: f32[2,1], index: 10, kind: output, shape index: {}]  }
   0x1   :  { %v41_v0 = vld [vmem:[%s3748_s2] sm:$0xff]  ;;  %v39_v1 = vld [vmem:[%s3749_s0 + $0x10] sm:$0xff]  ;;  %v40_v2 = vld [vmem:[%s3749_s0 + $0x18] sm:$0xff]  ;;  %2955 = vset.pattern.permute.xlu1 %v3111_v7  ;;  %2956 = vset.pattern.permute.xlu0 %v3111_v7  ;;  %s3115_s26 = smov 16   ;;  %s3116_s27 = smov 120   ;;  %vm277_vm10 = vcmask 60416  }
   0x2   :  { %2938 = vmatprep.subr.mxu1 %v41_v0  ;;  %2772 = vmatprep.mubr.msk.f32.mxu1 %vm42_vm0, %v39_v1  ;;  %v3192_v3 = vld [vmem:[%s3750_s3] sm:$0xff]  ;;  %v38_v6 = vld [vmem:[%s3749_s0 + $0x8] sm:$0xff]  ;;  %s3118_s30 = smov 80   ;;  %s3119_s11 = smov 88   ;;  %vm1304_vm11 = vcmask 126016   ;;  %vm2231_vm12 = vcmask 130048  }
   0x3   :  { %2939 = vmatpush3.msra.mxu1 %v41_v0  ;;  %2767 = vmatprep.subr.mxu0 %v41_v0  ;;  %v37_v4 = vld [vmem:[%s3749_s0] sm:$0xff]  ;;  %s3120_s12 = smov 40   ;;  %s3121_s13 = smov 48   ;;  %vm2461_vm13 = vcmask 195584   ;;  %vm2463_vm14 = vcmask 261120   ;;  %vm2465_vm15 = vcmask 326656  }
   0x4   :  { %2773 = vmatmul.mubr.msk.f32.vlgmr.msra.gmra.mrb[0].mxu1 %vm42_vm0, %v40_v2  ;;  %2775 = vmatprep.subr.mxu1 %v3109_v5  ;;  %v3221_v8 = vld [vmem:[%s3751_s1] sm:$0xf]  ;;  %s3112_s1 = smov 104  }
   0x5   :  { %2776 = vmatpush3.msra.mxu1 %v3192_v3  ;;  %2768 = vmatpush3.msra.mxu0 %v41_v0  ;;  %vm141_vm2 = vcmp.gt.s32.totalorder %v3221_v8, 0  ;;  %vm144_vm3 = vcmp.gt.s32.totalorder %v3221_v8, 1  ;;  %vm147_vm4 = vcmp.gt.s32.totalorder %v3221_v8, 2  ;;  %vm150_vm5 = vcmp.gt.s32.totalorder %v3221_v8, 3 }
   0x6   :  { %2769 = vmatprep.mubr.msk.f32.mxu0 %vm42_vm0, %v37_v4  ;;  %2777 = vmatprep.mubr.msk.f32.mxu1 %vm3110_vm1, %v3109_v5  ;;  %v2674_v9 = vsel %vm141_vm2, 1.0, %v3109_v5  ;;  %v2675_v46 = vsel %vm144_vm3, 1.0, %v3109_v5  ;;  %v2676_v4 = vsel %vm147_vm4, 1.0, %v3109_v5  ;;  %vm153_vm6 = vcmp.gt.s32.totalorder %v3221_v8, 4 }
   0x7   :  { %2770 = vmatmul.mubr.msk.f32.vlgmr.msra.gmra.mrb[0].mxu0 %vm42_vm0, %v38_v6  ;;  %2780 = vmatprep.subr.mxu1 %v3109_v5  ;;  %vm156_vm7 = vcmp.gt.s32.totalorder %v3221_v8, 5  ;;  %vm159_vm8 = vcmp.gt.s32.totalorder %v3221_v8, 6  ;;  %vm162_vm9 = vcmp.gt.s32.totalorder %v3221_v8, 7  ;;  %vm2469_vm2 = vcmask 457728  }
   0x8   :  { %2778 = vmatmul.mubr.f32.vlgmr.msra.gmra.mrb[2].mxu1 %v3109_v5  ;;  %2785 = vmatprep.subr.mxu0 %v3109_v5  ;;  %vm2486_vm3 = vcmask 523264   ;;  %vm2664_vm4 = vcmask 1024  }
   0x9   :  { %2781 = vmatpush3.msra.mxu1 %v3192_v3  ;;  %2782 = vmatprep.mubr.msk.f32.mxu1 %vm3110_vm1, %v3109_v5 }
   0xa   :  { %2786 = vmatpush3.msra.mxu0 %v3192_v3  ;;  %2787 = vmatprep.mubr.msk.f32.mxu0 %vm3110_vm1, %v3109_v5 }
   0xb   :  { %2790 = vmatprep.subr.mxu1 %v3109_v5  ;;  %2795 = vmatprep.subr.mxu0 %v3109_v5 }
   0xc   :  { %266 = vperm.xlu1 %2955, %v2674_v9  }
  0x8b   :  { %v3237_v29 = vpop.permute.xlu1 %266 }
  0xd7   :  { %v3225_v10 = vpop.f32.mrb[0].mxu1 }
  0xd8   :  { %v3227_v11 = vpop.f32.mrb[1].mxu1 }
  0xda   :  { %v3229_v12 = vpop.f32.mrb[0].mxu0 }
  0xdb   :  { %v3231_v13 = vpop.f32.mrb[1].mxu0  ;;  %v236_v14 = vpop.f32.mrb[2].mxu1 }
  0xdc   :  { %v240_v15 = vadd.f32 %v236_v14, %v3231_v13  ;;  %v2779_v16 = vpop.f32.mrb[3].mxu1 }
  0xde   :  { %2957 = vtanh.f32 %v240_v15  ;;  %v241_v18 = vsub.f32 0.0, %v240_v15 }
  0xe0   :  { %v242_v19 = vmul.f32 1.442695, %v241_v18 }
  0xe2   :  { %2959 = vpow2.f32 %v242_v19 }
  0xe8   :  { %v2958_v17 = vpop.eup %2957 }
  0xe9   :  { %249 = vrot.lane.b32.xlu0 %v2958_v17, %s3112_s1 }
  0xec   :  { %v2960_v20 = vpop.eup %2959 }
  0xed   :  { %v244_v21 = vadd.f32 1.0, %v2960_v20 }
  0xef   :  { %2961 = vrcp.f32 %v244_v21 }
  0xf9   :  { %v2962_v22 = vpop.eup %2961 }
  0xfa   :  { %v247_v25 = vmul.f32 0.0, %v2962_v22 }
 0x15b   :  { %v250_v23 = vpop.permute.xlu0 %249 }
 0x15c   :  { %v252_v24 = vmul.f32 %v2962_v22, %v250_v23 }
 0x15e   :  { %254 = vrot.lane.b32.xlu0 %v252_v24, %s3113_s24 }
 0x1d0   :  { %v255_v26 = vpop.permute.xlu0 %254 }
 0x1d1   :  { %v257_v27 = vadd.f32 %v255_v26, %v247_v25 }
 0x1d3   :  { %2963 = vtanh.f32 %v257_v27  ;;  %v271_v47 = vmul.f32 %v3237_v29, %v257_v27 }
 0x1d5   :  { %v365_v48 = vrot.slane %v271_v47, 4 }
 0x1dd   :  { %v2964_v28 = vpop.eup %2963 }
 0x1de   :  { %260 = vrot.lane.b32.xlu1 %v2964_v28, %s3113_s24 }
 0x250   :  { %v261_v30 = vpop.permute.xlu1 %260 }
 0x251   :  { %v263_v31 = vmul.f32 %v2962_v22, %v261_v30 }
 0x253   :  { %v3240_v32 = vmul.f32 %v3237_v29, %v263_v31 }
 0x255   :  { %280 = vrot.lane.b32.xlu0 %v3240_v32, %s3114_s25  ;;  %v395_v55 = vrot.slane %v3240_v32, 4 }
 0x2c7   :  { %v281_v33 = vpop.permute.xlu0 %280 }
 0x2c8   :  { %2783 = vmatmul.mubr.msk.f32.vlgmr.msra.gmra.mrb[4].mxu1 %vm42_vm0, %v281_v33 }
 0x2c9   :  { %2791 = vmatpush3.msra.mxu1 %v3192_v3  ;;  %2792 = vmatprep.mubr.msk.f32.mxu1 %vm3110_vm1, %v3109_v5 }
 0x2ca   :  { %2800 = vmatprep.subr.mxu1 %v3109_v5 }
 0x39b   :  { %v350_v34 = vpop.f32.mrb[4].mxu1 }
 0x39c   :  { %v355_v35 = vrot.slane %v350_v34, 4  ;;  %v2784_v36 = vpop.f32.mrb[5].mxu1 }
 0x39e   :  { %v357_v37 = vadd.f32 %v355_v35, %v3231_v13 }
 0x3a0   :  { %2965 = vtanh.f32 %v357_v37  ;;  %v358_v39 = vsub.f32 0.0, %v357_v37 }
 0x3a2   :  { %v359_v40 = vmul.f32 1.442695, %v358_v39 }
 0x3a4   :  { %2967 = vpow2.f32 %v359_v40 }
 0x3aa   :  { %v2966_v38 = vpop.eup %2965 }
 0x3ab   :  { %369 = vrot.lane.b32.xlu1 %v2966_v38, %s3112_s1 }
 0x3ae   :  { %v2968_v41 = vpop.eup %2967 }
 0x3af   :  { %v361_v42 = vadd.f32 1.0, %v2968_v41 }
 0x3b1   :  { %2969 = vrcp.f32 %v361_v42 }
 0x3bb   :  { %v2970_v43 = vpop.eup %2969 }
 0x3bc   :  { %v367_v49 = vmul.f32 %v2970_v43, %v365_v48 }
 0x41d   :  { %v370_v44 = vpop.permute.xlu1 %369 }
 0x41e   :  { %v372_v45 = vmul.f32 %v2970_v43, %v370_v44 }
 0x420   :  { %374 = vrot.lane.b32.xlu0 %v372_v45, %s3113_s24 }
 0x424   :  { %386 = vperm.xlu0 %2956, %v2675_v46  }
 0x492   :  { %v375_v50 = vpop.permute.xlu0 %374 }
 0x493   :  { %v377_v51 = vadd.f32 %v375_v50, %v367_v49  ;;  %v2677_v50 = vsel %vm150_vm5, 1.0, %v3109_v5 }
 0x495   :  { %2971 = vtanh.f32 %v377_v51  ;;  %v409_v60 = vsub.f32 %v377_v51, %v365_v48 }
 0x497   :  { %v411_v62 = vrot.slane %v409_v60, 4 }
 0x49f   :  { %v2972_v52 = vpop.eup %2971 }
 0x4a0   :  { %380 = vrot.lane.b32.xlu1 %v2972_v52, %s3113_s24 }
 0x4a3   :  { %v3261_v58 = vpop.permute.xlu0 %386 }
 0x512   :  { %v381_v53 = vpop.permute.xlu1 %380 }
 0x513   :  { %v3256_v54 = vmul.f32 %v2970_v43, %v381_v53 }
 0x515   :  { %v397_v56 = vsub.f32 %v3256_v54, %v395_v55 }
 0x517   :  { %v399_v57 = vrot.slane %v397_v56, 4 }
 0x519   :  { %400 = vrot.lane.b32.xlu1 %v399_v57, %s3114_s25 }
 0x58b   :  { %v401_v59 = vpop.permute.xlu1 %400 }
 0x58c   :  { %v403_v61 = vmul.f32 %v401_v59, %v3261_v58 }
 0x58e   :  { %405 = vrot.lane.b32.xlu1 %v403_v61, %s3115_s26 }
 0x592   :  { %412 = vrot.lane.b32.xlu1 %v411_v62, %s3116_s27 }
 0x600   :  { %v406_v63 = vpop.permute.xlu1 %405 }
 0x601   :  { %v408_v0 = vadd.f32 %v406_v63, %v3240_v32 }
 0x603   :  { %423 = vrot.lane.b32.xlu0 %v408_v0, %s3114_s25 }
 0x604   :  { %v413_v1 = vpop.permute.xlu1 %412 }
 0x605   :  { %v415_v2 = vmul.f32 %v413_v1, %v3261_v58 }
 0x607   :  { %417 = vrot.lane.b32.xlu1 %v415_v2, %s3113_s24 }
 0x60b   :  { %523 = vperm.xlu1 %2955, %v2676_v4  }
 0x675   :  { %v424_v6 = vpop.permute.xlu0 %423 }
 0x676   :  { %2788 = vmatmul.mubr.msk.f32.vlgmr.msra.gmra.mrb[2].mxu0 %vm42_vm0, %v424_v6 }
 0x677   :  { %2796 = vmatpush3.msra.mxu0 %v3192_v3  ;;  %2797 = vmatprep.mubr.msk.f32.mxu0 %vm3110_vm1, %v3109_v5 }
 0x678   :  { %2805 = vmatprep.subr.mxu0 %v3109_v5 }
 0x679   :  { %v418_v23 = vpop.permute.xlu1 %417 }
 0x67a   :  { %v420_v24 = vadd.f32 %v418_v23, %v271_v47 }
 0x68a   :  { %v3284_v34 = vpop.permute.xlu1 %523 }
 0x749   :  { %v493_v7 = vpop.f32.mrb[2].mxu0 }
 0x74a   :  { %v497_v9 = vadd.f32 %v3229_v12, %v493_v7  ;;  %v2789_v14 = vpop.f32.mrb[3].mxu0 }
 0x74c   :  { %2973 = vtanh.f32 %v497_v9  ;;  %v498_v16 = vsub.f32 0.0, %v497_v9 }
 0x74e   :  { %v499_v17 = vmul.f32 1.442695, %v498_v16 }
 0x750   :  { %2975 = vpow2.f32 %v499_v17 }
 0x756   :  { %v2974_v15 = vpop.eup %2973 }
 0x757   :  { %506 = vrot.lane.b32.xlu0 %v2974_v15, %s3112_s1 }
 0x75a   :  { %v2976_v18 = vpop.eup %2975 }
 0x75b   :  { %v501_v19 = vadd.f32 1.0, %v2976_v18  ;;  %v2678_v18 = vsel %vm153_vm6, 1.0, %v3109_v5 }
 0x75d   :  { %2977 = vrcp.f32 %v501_v19 }
 0x767   :  { %v2978_v20 = vpop.eup %2977 }
 0x768   :  { %v504_v25 = vmul.f32 %v2978_v20, %v420_v24 }
 0x7c9   :  { %v507_v21 = vpop.permute.xlu0 %506 }
 0x7ca   :  { %v509_v22 = vmul.f32 %v2978_v20, %v507_v21 }
 0x7cc   :  { %511 = vrot.lane.b32.xlu0 %v509_v22, %s3113_s24 }
 0x83e   :  { %v512_v26 = vpop.permute.xlu0 %511 }
 0x83f   :  { %v514_v27 = vadd.f32 %v512_v26, %v504_v25 }
 0x841   :  { %2979 = vtanh.f32 %v514_v27  ;;  %v530_v51 = vsub.f32 %v514_v27, %v420_v24 }
 0x843   :  { %v531_v52 = vmul.f32 %v530_v51, %v3284_v34 }
 0x845   :  { %v532_v53 = vadd.f32 %v531_v52, %v420_v24 }
 0x847   :  { %v624_v55 = vrot.slane %v532_v53, 4 }
 0x84b   :  { %v2980_v28 = vpop.eup %2979 }
 0x84c   :  { %517 = vrot.lane.b32.xlu0 %v2980_v28, %s3113_s24 }
 0x8be   :  { %v518_v30 = vpop.permute.xlu0 %517 }
 0x8bf   :  { %v3281_v31 = vmul.f32 %v2978_v20, %v518_v30 }
 0x8c1   :  { %v527_v33 = vsub.f32 %v3281_v31, %v408_v0 }
 0x8c3   :  { %v528_v35 = vmul.f32 %v527_v33, %v3284_v34 }
 0x8c5   :  { %v529_v36 = vadd.f32 %v528_v35, %v408_v0 }
 0x8c7   :  { %539 = vrot.lane.b32.xlu1 %v529_v36, %s3114_s25  ;;  %v654_v63 = vrot.slane %v529_v36, 4 }
 0x939   :  { %v540_v37 = vpop.permute.xlu1 %539 }
 0x93a   :  { %2793 = vmatmul.mubr.msk.f32.vlgmr.msra.gmra.mrb[6].mxu1 %vm42_vm0, %v540_v37 }
 0x93b   :  { %2801 = vmatpush3.msra.mxu1 %v3192_v3  ;;  %2802 = vmatprep.mubr.msk.f32.mxu1 %vm3110_vm1, %v3109_v5 }
 0x93c   :  { %2810 = vmatprep.subr.mxu1 %v3109_v5 }
 0xa0d   :  { %v609_v38 = vpop.f32.mrb[6].mxu1 }
 0xa0e   :  { %v614_v39 = vrot.slane %v609_v38, 4  ;;  %v2794_v40 = vpop.f32.mrb[7].mxu1 }
 0xa10   :  { %v616_v41 = vadd.f32 %v3229_v12, %v614_v39 }
 0xa12   :  { %2981 = vtanh.f32 %v616_v41  ;;  %v617_v43 = vsub.f32 0.0, %v616_v41 }
 0xa14   :  { %v618_v44 = vmul.f32 1.442695, %v617_v43 }
 0xa16   :  { %2983 = vpow2.f32 %v618_v44 }
 0xa1c   :  { %v2982_v42 = vpop.eup %2981 }
 0xa1d   :  { %628 = vrot.lane.b32.xlu0 %v2982_v42, %s3112_s1 }
 0xa20   :  { %v2984_v45 = vpop.eup %2983 }
 0xa21   :  { %v620_v46 = vadd.f32 1.0, %v2984_v45 }
 0xa23   :  { %2985 = vrcp.f32 %v620_v46 }
 0xa2d   :  { %v2986_v47 = vpop.eup %2985 }
 0xa2e   :  { %v626_v56 = vmul.f32 %v2986_v47, %v624_v55 }
 0xa8f   :  { %v629_v48 = vpop.permute.xlu0 %628 }
 0xa90   :  { %v631_v49 = vmul.f32 %v2986_v47, %v629_v48 }
 0xa92   :  { %633 = vrot.lane.b32.xlu1 %v631_v49, %s3113_s24 }
 0xa96   :  { %645 = vperm.xlu1 %2955, %v2677_v50  }
 0xb04   :  { %v634_v57 = vpop.permute.xlu1 %633 }
 0xb05   :  { %v636_v59 = vadd.f32 %v634_v57, %v626_v56 }
 0xb07   :  { %2987 = vtanh.f32 %v636_v59  ;;  %v668_v6 = vsub.f32 %v636_v59, %v624_v55 }
 0xb09   :  { %v670_v9 = vrot.slane %v668_v6, 4 }
 0xb11   :  { %v2988_v60 = vpop.eup %2987 }
 0xb12   :  { %639 = vrot.lane.b32.xlu0 %v2988_v60, %s3113_s24 }
 0xb15   :  { %v3304_v2 = vpop.permute.xlu1 %645 }
 0xb84   :  { %v640_v61 = vpop.permute.xlu0 %639 }
 0xb85   :  { %v3300_v62 = vmul.f32 %v2986_v47, %v640_v61  ;;  %v2679_v61 = vsel %vm156_vm7, 1.0, %v3109_v5 }
 0xb87   :  { %v656_v0 = vsub.f32 %v3300_v62, %v654_v63 }
 0xb89   :  { %v658_v1 = vrot.slane %v656_v0, 4 }
 0xb8b   :  { %659 = vrot.lane.b32.xlu0 %v658_v1, %s3114_s25 }
 0xbfd   :  { %v660_v4 = vpop.permute.xlu0 %659 }
 0xbfe   :  { %v662_v7 = vmul.f32 %v660_v4, %v3304_v2 }
 0xc00   :  { %664 = vrot.lane.b32.xlu1 %v662_v7, %s3115_s26 }
 0xc04   :  { %671 = vrot.lane.b32.xlu1 %v670_v9, %s3116_s27 }
 0xc72   :  { %v665_v14 = vpop.permute.xlu1 %664 }
 0xc73   :  { %v667_v15 = vadd.f32 %v665_v14, %v529_v36 }
 0xc75   :  { %682 = vrot.lane.b32.xlu0 %v667_v15, %s3114_s25 }
 0xc76   :  { %v672_v16 = vpop.permute.xlu1 %671 }
 0xc77   :  { %v674_v17 = vmul.f32 %v672_v16, %v3304_v2 }
 0xc79   :  { %676 = vrot.lane.b32.xlu1 %v674_v17, %s3113_s24 }
 0xc7d   :  { %782 = vperm.xlu1 %2955, %v2678_v18  }
 0xce7   :  { %v683_v19 = vpop.permute.xlu0 %682 }
 0xce8   :  { %2798 = vmatmul.mubr.msk.f32.vlgmr.msra.gmra.mrb[4].mxu0 %vm42_vm0, %v683_v19 }
 0xce9   :  { %2806 = vmatpush3.msra.mxu0 %v3192_v3  ;;  %2807 = vmatprep.mubr.msk.f32.mxu0 %vm3110_vm1, %v3109_v5 }
 0xcea   :  { %2815 = vmatprep.subr.mxu0 %v3109_v5 }
 0xceb   :  { %v677_v35 = vpop.permute.xlu1 %676 }
 0xcec   :  { %v679_v36 = vadd.f32 %v677_v35, %v532_v53 }
 0xcfc   :  { %v3326_v44 = vpop.permute.xlu1 %782 }
 0xdbb   :  { %v752_v20 = vpop.f32.mrb[4].mxu0 }
 0xdbc   :  { %v756_v21 = vadd.f32 %v752_v20, %v3227_v11  ;;  %v2799_v22 = vpop.f32.mrb[5].mxu0 }
 0xdbe   :  { %2989 = vtanh.f32 %v756_v21  ;;  %v757_v24 = vsub.f32 0.0, %v756_v21 }
 0xdc0   :  { %v758_v25 = vmul.f32 1.442695, %v757_v24 }
 0xdc2   :  { %2991 = vpow2.f32 %v758_v25 }
 0xdc8   :  { %v2990_v23 = vpop.eup %2989 }
 0xdc9   :  { %765 = vrot.lane.b32.xlu0 %v2990_v23, %s3112_s1 }
 0xdcc   :  { %v2992_v26 = vpop.eup %2991 }
 0xdcd   :  { %v760_v27 = vadd.f32 1.0, %v2992_v26 }
 0xdcf   :  { %2993 = vrcp.f32 %v760_v27  ;;  %v3361_v27 = vld [vmem:[%s3752_s4] sm:$0xff]  ;;  %s3117_s4 = smov 32  }
 0xdd9   :  { %v2994_v28 = vpop.eup %2993 }
 0xdda   :  { %v763_v37 = vmul.f32 %v2994_v28, %v679_v36 }
 0xe3b   :  { %v766_v30 = vpop.permute.xlu0 %765 }
 0xe3c   :  { %v768_v33 = vmul.f32 %v2994_v28, %v766_v30 }
 0xe3e   :  { %770 = vrot.lane.b32.xlu0 %v768_v33, %s3113_s24 }
 0xeb0   :  { %v771_v38 = vpop.permute.xlu0 %770 }
 0xeb1   :  { %v773_v39 = vadd.f32 %v771_v38, %v763_v37 }
 0xeb3   :  { %2995 = vtanh.f32 %v773_v39  ;;  %v789_v63 = vsub.f32 %v773_v39, %v679_v36 }
 0xeb5   :  { %v790_v0 = vmul.f32 %v789_v63, %v3326_v44 }
 0xeb7   :  { %v3341_v1 = vadd.f32 %v790_v0, %v679_v36 }
 0xeb9   :  { %v883_v4 = vrot.slane %v3341_v1, 4 }
 0xebd   :  { %v2996_v40 = vpop.eup %2995 }
 0xebe   :  { %776 = vrot.lane.b32.xlu0 %v2996_v40, %s3113_s24 }
 0xf30   :  { %v777_v41 = vpop.permute.xlu0 %776 }
 0xf31   :  { %v3323_v42 = vmul.f32 %v2994_v28, %v777_v41 }
 0xf33   :  { %v786_v43 = vsub.f32 %v3323_v42, %v667_v15 }
 0xf35   :  { %v787_v45 = vmul.f32 %v786_v43, %v3326_v44 }
 0xf37   :  { %v788_v46 = vadd.f32 %v787_v45, %v667_v15 }
 0xf39   :  { %798 = vrot.lane.b32.xlu1 %v788_v46, %s3114_s25  ;;  %v913_v17 = vrot.slane %v788_v46, 4 }
 0xfab   :  { %v799_v47 = vpop.permute.xlu1 %798 }
 0xfac   :  { %2803 = vmatmul.mubr.msk.f32.vlgmr.msra.gmra.mrb[8].mxu1 %vm42_vm0, %v799_v47 }
 0xfad   :  { %2811 = vmatpush3.msra.mxu1 %v3192_v3  ;;  %2812 = vmatprep.mubr.msk.f32.mxu1 %vm3110_vm1, %v3109_v5 }
 0xfae   :  { %2820 = vmatprep.subr.mxu1 %v3109_v5 }
0x107f   :  { %v868_v48 = vpop.f32.mrb[8].mxu1 }
0x1080   :  { %v873_v49 = vrot.slane %v868_v48, 4  ;;  %v2804_v50 = vpop.f32.mrb[9].mxu1 }
0x1082   :  { %v875_v51 = vadd.f32 %v873_v49, %v3227_v11 }
0x1084   :  { %2997 = vtanh.f32 %v875_v51  ;;  %v876_v53 = vsub.f32 0.0, %v875_v51 }
0x1086   :  { %v877_v55 = vmul.f32 1.442695, %v876_v53 }
0x1088   :  { %2999 = vpow2.f32 %v877_v55  ;;  %v2680_v55 = vsel %vm159_vm8, 1.0, %v3109_v5 }
0x108e   :  { %v2998_v52 = vpop.eup %2997 }
0x108f   :  { %887 = vrot.lane.b32.xlu0 %v2998_v52, %s3112_s1 }
0x1092   :  { %v3000_v56 = vpop.eup %2999 }
0x1093   :  { %v879_v57 = vadd.f32 1.0, %v3000_v56 }
0x1095   :  { %3001 = vrcp.f32 %v879_v57 }
0x109f   :  { %v3002_v3 = vpop.eup %3001 }
0x10a0   :  { %v885_v6 = vmul.f32 %v3002_v3, %v883_v4 }
0x1101   :  { %v888_v59 = vpop.permute.xlu0 %887 }
0x1102   :  { %v890_v60 = vmul.f32 %v3002_v3, %v888_v59 }
0x1104   :  { %892 = vrot.lane.b32.xlu1 %v890_v60, %s3113_s24 }
0x1108   :  { %904 = vperm.xlu1 %2955, %v2679_v61  }
0x1176   :  { %v893_v7 = vpop.permute.xlu1 %892 }
0x1177   :  { %v895_v9 = vadd.f32 %v893_v7, %v885_v6 }
0x1179   :  { %3003 = vtanh.f32 %v895_v9  ;;  %v927_v24 = vsub.f32 %v895_v9, %v883_v4 }
0x117b   :  { %v929_v26 = vrot.slane %v927_v24, 4 }
0x1183   :  { %v3004_v14 = vpop.eup %3003 }
0x1184   :  { %898 = vrot.lane.b32.xlu0 %v3004_v14, %s3113_s24 }
0x1187   :  { %v3349_v20 = vpop.permute.xlu1 %904 }
0x11f6   :  { %v899_v15 = vpop.permute.xlu0 %898 }
0x11f7   :  { %v3345_v16 = vmul.f32 %v3002_v3, %v899_v15 }
0x11f9   :  { %v915_v18 = vsub.f32 %v3345_v16, %v913_v17 }
0x11fb   :  { %v917_v19 = vrot.slane %v915_v18, 4 }
0x11fd   :  { %918 = vrot.lane.b32.xlu0 %v917_v19, %s3114_s25 }
0x126f   :  { %v919_v21 = vpop.permute.xlu0 %918 }
0x1270   :  { %v921_v22 = vmul.f32 %v919_v21, %v3349_v20 }
0x1272   :  { %923 = vrot.lane.b32.xlu1 %v921_v22, %s3115_s26 }
0x12e4   :  { %v924_v23 = vpop.permute.xlu1 %923 }
0x12e5   :  { %v3353_v25 = vadd.f32 %v924_v23, %v788_v46 }
0x12e7   :  { %941 = vrot.lane.b32.xlu0 %v3353_v25, %s3114_s25 }
0x12eb   :  { %930 = vrot.lane.b32.xlu0 %v929_v26, %s3116_s27 }
0x1359   :  { %v942_v28 = vpop.permute.xlu0 %941 }
0x135a   :  { %2808 = vmatmul.mubr.msk.f32.vlgmr.msra.gmra.mrb[6].mxu0 %vm42_vm0, %v942_v28 }
0x135b   :  { %2816 = vmatpush3.msra.mxu0 %v3361_v27  ;;  %2817 = vmatprep.mubr.msk.f32.mxu0 %vm3110_vm1, %v3109_v5 }
0x135c   :  { %2825 = vmatprep.subr.mxu0 %v3109_v5 }
0x135d   :  { %v931_v40 = vpop.permute.xlu0 %930 }
0x135e   :  { %2818 = vmatmul.mubr.f32.vlgmr.msra.gmra.mrb[8].mxu0 %v3109_v5  ;;  %v933_v41 = vmul.f32 %v931_v40, %v3349_v20 }
0x135f   :  { %2826 = vmatpush3.msra.mxu0 %v3361_v27  ;;  %2827 = vmatprep.mubr.msk.f32.mxu0 %vm3110_vm1, %v3109_v5 }
0x1360   :  { %2835 = vmatprep.subr.mxu0 %v3109_v5 }
0x142d   :  { %v1011_v30 = vpop.f32.mrb[6].mxu0 }
0x142e   :  { %v1015_v33 = vadd.f32 %v3225_v10, %v1011_v30  ;;  %v2809_v35 = vpop.f32.mrb[7].mxu0 }
0x1430   :  { %3005 = vtanh.f32 %v1015_v33  ;;  %v1016_v43 = vsub.f32 0.0, %v1015_v33 }
0x1431   :  { %v1253_v36 = vpop.f32.mrb[8].mxu0 }
0x1432   :  { %v1258_v37 = vrot.slane %v1253_v36, 4  ;;  %v2819_v38 = vpop.f32.mrb[9].mxu0  ;;  %v1017_v45 = vmul.f32 1.442695, %v1016_v43 }
0x1434   :  { %1259 = vrot.lane.b32.xlu1 %v1258_v37, %s3117_s4  ;;  %3007 = vpow2.f32 %v1017_v45 }
0x143a   :  { %v3006_v39 = vpop.eup %3005 }
0x143b   :  { %1024 = vrot.lane.b32.xlu1 %v3006_v39, %s3112_s1 }
0x143e   :  { %v3008_v46 = vpop.eup %3007 }
0x143f   :  { %935 = vrot.lane.b32.xlu1 %v933_v41, %s3113_s24  ;;  %v1019_v48 = vadd.f32 1.0, %v3008_v46 }
0x14a6   :  { %v1260_v47 = vpop.permute.xlu1 %1259 }
0x14a7   :  { %v1262_v49 = vadd.f32 %v3225_v10, %v1260_v47 }
0x14a9   :  { %3009 = vtanh.f32 %v1262_v49  ;;  %v1263_v56 = vsub.f32 0.0, %v1262_v49 }
0x14aa   :  { %3011 = vrcp.f32 %v1019_v48 }
0x14ab   :  { %v1264_v57 = vmul.f32 1.442695, %v1263_v56 }
0x14ad   :  { %v1025_v51 = vpop.permute.xlu1 %1024  ;;  %3013 = vpow2.f32 %v1264_v57 }
0x14b1   :  { %v936_v60 = vpop.permute.xlu1 %935 }
0x14b2   :  { %v3384_v61 = vadd.f32 %v936_v60, %v3341_v1  ;;  %v2681_v1 = vsel %vm162_vm9, 1.0, %v3109_v5 }
0x14b3   :  { %v3010_v50 = vpop.eup %3009 }
0x14b4   :  { %1271 = vrot.lane.b32.xlu0 %v3010_v50, %s3112_s1  ;;  %v3012_v52 = vpop.eup %3011 }
0x14b5   :  { %v1027_v53 = vmul.f32 %v3012_v52, %v1025_v51  ;;  %v1022_v6 = vmul.f32 %v3012_v52, %v3384_v61 }
0x14b7   :  { %v3014_v3 = vpop.eup %3013 }
0x14b8   :  { %1029 = vrot.lane.b32.xlu0 %v1027_v53, %s3113_s24  ;;  %v1266_v59 = vadd.f32 1.0, %v3014_v3 }
0x14ba   :  { %3015 = vrcp.f32 %v1266_v59 }
0x14bc   :  { %1041 = vperm.xlu0 %2956, %v2680_v55  }
0x14c4   :  { %v3016_v63 = vpop.eup %3015 }
0x14c5   :  { %v1269_v15 = vmul.f32 0.0, %v3016_v63 }
0x1526   :  { %v1272_v0 = vpop.permute.xlu0 %1271 }
0x1527   :  { %v1274_v4 = vmul.f32 %v3016_v63, %v1272_v0 }
0x1529   :  { %1276 = vrot.lane.b32.xlu1 %v1274_v4, %s3113_s24 }
0x152a   :  { %v1030_v7 = vpop.permute.xlu0 %1029 }
0x152b   :  { %v3388_v9 = vadd.f32 %v1030_v7, %v1022_v6 }
0x152d   :  { %3017 = vtanh.f32 %v3388_v9 }
0x1537   :  { %v3018_v14 = vpop.eup %3017 }
0x1538   :  { %1035 = vrot.lane.b32.xlu1 %v3018_v14, %s3113_s24 }
0x153b   :  { %v3399_v8 = vpop.permute.xlu0 %1041 }
0x153c   :  { %1163 = vperm.xlu1 %2955, %v2681_v1  }
0x159b   :  { %v1277_v17 = vpop.permute.xlu1 %1276 }
0x159c   :  { %v1279_v18 = vadd.f32 %v1277_v17, %v1269_v15 }
0x159e   :  { %3019 = vtanh.f32 %v1279_v18  ;;  %v1294_v35 = vrot.slane %v1279_v18, 4 }
0x15a8   :  { %v3020_v19 = vpop.eup %3019 }
0x15a9   :  { %1282 = vrot.lane.b32.xlu0 %v3020_v19, %s3113_s24 }
0x15aa   :  { %v1036_v21 = vpop.permute.xlu1 %1035 }
0x15ab   :  { %v3395_v22 = vmul.f32 %v3012_v52, %v1036_v21 }
0x15ad   :  { %v1045_v23 = vsub.f32 %v3395_v22, %v3353_v25 }
0x15af   :  { %v1046_v24 = vmul.f32 %v1045_v23, %v3399_v8 }
0x15b1   :  { %v3403_v26 = vadd.f32 %v1046_v24, %v3353_v25 }
0x15b3   :  { %1057 = vrot.lane.b32.xlu0 %v3403_v26, %s3114_s25 }
0x15bb   :  { %v3414_v25 = vpop.permute.xlu1 %1163 }
0x161b   :  { %v1283_v28 = vpop.permute.xlu0 %1282 }
0x161c   :  { %v1285_v30 = vmul.f32 %v3016_v63, %v1283_v28 }
0x161e   :  { %v1287_v33 = vrot.slane %v1285_v30, 4 }
0x1620   :  { %1288 = vrot.lane.b32.xlu1 %v1287_v33, %s3118_s30 }
0x1624   :  { %1295 = vrot.lane.b32.xlu1 %v1294_v35, %s3119_s11 }
0x1625   :  { %v1058_v36 = vpop.permute.xlu0 %1057 }
0x1626   :  { %2813 = vmatmul.mubr.msk.f32.vlgmr.msra.gmra.mrb[10].mxu1 %vm42_vm0, %v1058_v36 }
0x1627   :  { %2821 = vmatpush3.msra.mxu1 %v3361_v27  ;;  %2822 = vmatprep.mubr.msk.f32.mxu1 %vm3110_vm1, %v3109_v5 }
0x1628   :  { %2830 = vmatprep.subr.mxu1 %v3109_v5 }
0x1692   :  { %v1289_v37 = vpop.permute.xlu1 %1288 }
0x1693   :  { %v3417_v38 = vmul.f32 %v1289_v37, %v3414_v25 }
0x1695   :  { %2823 = vmatmul.mubr.msk.f32.vlgmr.msra.gmra.mrb[12].mxu1 %vm42_vm0, %v3417_v38 }
0x1696   :  { %v1296_v39 = vpop.permute.xlu1 %1295  ;;  %2831 = vmatpush3.msra.mxu1 %v3361_v27  ;;  %2832 = vmatprep.mubr.msk.f32.mxu1 %vm3110_vm1, %v3109_v5 }
0x1697   :  { %v1298_v40 = vmul.f32 %v1296_v39, %v3414_v25  ;;  %2840 = vmatprep.subr.mxu1 %v3109_v5 }
0x1699   :  { %1391 = vrot.lane.b32.xlu1 %v1298_v40, %s3120_s12 }
0x16f9   :  { %v1127_v41 = vpop.f32.mrb[10].mxu1 }
0x16fa   :  { %v1132_v43 = vrot.slane %v1127_v41, 4  ;;  %v2814_v45 = vpop.f32.mrb[11].mxu1 }
0x16fc   :  { %v3428_v46 = vadd.f32 %v3225_v10, %v1132_v43 }
0x1768   :  { %v1375_v47 = vpop.f32.mrb[12].mxu1 }
0x1769   :  { %1380 = vrot.lane.b32.xlu0 %v1375_v47, %s3117_s4  ;;  %v2824_v48 = vpop.f32.mrb[13].mxu1 }
0x17db   :  { %v1381_v49 = vpop.permute.xlu0 %1380 }
0x17dc   :  { %v1383_v50 = vadd.f32 %v3225_v10, %v1381_v49  ;;  %v1392_v10 = vpop.permute.xlu1 %1391 }
0x17de   :  { %3021 = vtanh.f32 %v1383_v50  ;;  %v1384_v52 = vsub.f32 0.0, %v1383_v50 }
0x17e0   :  { %v1385_v53 = vmul.f32 1.442695, %v1384_v52 }
0x17e2   :  { %3023 = vpow2.f32 %v1385_v53 }
0x17e8   :  { %v3022_v51 = vpop.eup %3021 }
0x17e9   :  { %1396 = vrot.lane.b32.xlu0 %v3022_v51, %s3112_s1 }
0x17ec   :  { %v3024_v55 = vpop.eup %3023 }
0x17ed   :  { %v1387_v56 = vadd.f32 1.0, %v3024_v55 }
0x17ef   :  { %3025 = vrcp.f32 %v1387_v56 }
0x17f9   :  { %v3026_v57 = vpop.eup %3025 }
0x17fa   :  { %v1394_v60 = vmul.f32 %v3026_v57, %v1392_v10 }
0x185b   :  { %v1397_v3 = vpop.permute.xlu0 %1396 }
0x185c   :  { %v1399_v59 = vmul.f32 %v3026_v57, %v1397_v3 }
0x185e   :  { %1401 = vrot.lane.b32.xlu0 %v1399_v59, %s3113_s24 }
0x1862   :  { %1412 = vrot.lane.b32.xlu0 %v3417_v38, %s3121_s13 }
0x18d0   :  { %v1402_v63 = vpop.permute.xlu0 %1401 }
0x18d1   :  { %v1404_v0 = vadd.f32 %v1402_v63, %v1394_v60 }
0x18d3   :  { %3027 = vtanh.f32 %v1404_v0  ;;  %v1422_v15 = vsub.f32 %v1404_v0, %v1392_v10 }
0x18d4   :  { %v1413_v14 = vpop.permute.xlu0 %1412 }
0x18d5   :  { %v1423_v18 = vmul.f32 %v1422_v15, %v3399_v8 }
0x18dd   :  { %v3028_v4 = vpop.eup %3027 }
0x18de   :  { %1407 = vrot.lane.b32.xlu1 %v3028_v4, %s3113_s24 }
0x1950   :  { %v1408_v6 = vpop.permute.xlu1 %1407 }
0x1951   :  { %v3437_v7 = vmul.f32 %v3026_v57, %v1408_v6 }
0x1953   :  { %v1415_v1 = vsub.f32 %v3437_v7, %v1413_v14 }
0x1955   :  { %v1416_v17 = vmul.f32 %v1415_v1, %v3399_v8 }
0x1957   :  { %1418 = vrot.lane.b32.xlu1 %v1416_v17, %s3118_s30 }
0x195b   :  { %1425 = vrot.lane.b32.xlu1 %v1423_v18, %s3119_s11 }
0x19c9   :  { %v1419_v19 = vpop.permute.xlu1 %1418 }
0x19ca   :  { %v1421_v21 = vadd.f32 %v1419_v19, %v3417_v38 }
0x19cc   :  { %2828 = vmatmul.mubr.msk.f32.vlgmr.msra.gmra.mrb[10].mxu0 %vm42_vm0, %v1421_v21  ;;  %v1547_v50 = vrot.slane %v1421_v21, 4 }
0x19cd   :  { %v1426_v23 = vpop.permute.xlu1 %1425  ;;  %2836 = vmatpush3.msra.mxu0 %v3361_v27  ;;  %2837 = vmatprep.mubr.msk.f32.mxu0 %vm3110_vm1, %v3109_v5 }
0x19ce   :  { %v1428_v24 = vadd.f32 %v1426_v23, %v1298_v40  ;;  %2845 = vmatprep.subr.mxu0 %v3109_v5 }
0x19d0   :  { %v1520_v28 = vrot.slane %v1428_v24, 4 }
0x19d2   :  { %1521 = vrot.lane.b32.xlu1 %v1520_v28, %s3120_s12 }
0x1a44   :  { %v1522_v51 = vpop.permute.xlu1 %1521 }
0x1a9f   :  { %v1503_v30 = vpop.f32.mrb[10].mxu0 }
0x1aa0   :  { %v1508_v33 = vrot.slane %v1503_v30, 4  ;;  %v2829_v35 = vpop.f32.mrb[11].mxu0 }
0x1aa2   :  { %1509 = vrot.lane.b32.xlu0 %v1508_v33, %s3117_s4 }
0x1b14   :  { %v1510_v36 = vpop.permute.xlu0 %1509 }
0x1b15   :  { %v1512_v37 = vadd.f32 %v1510_v36, %v3227_v11 }
0x1b17   :  { %3029 = vtanh.f32 %v1512_v37  ;;  %v1513_v41 = vsub.f32 0.0, %v1512_v37 }
0x1b19   :  { %v1514_v43 = vmul.f32 1.442695, %v1513_v41 }
0x1b1b   :  { %3031 = vpow2.f32 %v1514_v43 }
0x1b21   :  { %v3030_v39 = vpop.eup %3029 }
0x1b22   :  { %1526 = vrot.lane.b32.xlu0 %v3030_v39, %s3112_s1 }
0x1b25   :  { %v3032_v40 = vpop.eup %3031 }
0x1b26   :  { %v1516_v45 = vadd.f32 1.0, %v3032_v40 }
0x1b28   :  { %3033 = vrcp.f32 %v1516_v45 }
0x1b32   :  { %v3034_v47 = vpop.eup %3033 }
0x1b33   :  { %v1524_v52 = vmul.f32 %v3034_v47, %v1522_v51 }
0x1b94   :  { %v1527_v48 = vpop.permute.xlu0 %1526 }
0x1b95   :  { %v1529_v49 = vmul.f32 %v3034_v47, %v1527_v48 }
0x1b97   :  { %1531 = vrot.lane.b32.xlu0 %v1529_v49, %s3113_s24 }
0x1b9b   :  { %1548 = vrot.lane.b32.xlu0 %v1547_v50, %s3121_s13 }
0x1c09   :  { %v1532_v53 = vpop.permute.xlu0 %1531 }
0x1c0a   :  { %v1534_v55 = vadd.f32 %v1532_v53, %v1524_v52 }
0x1c0c   :  { %3035 = vtanh.f32 %v1534_v55  ;;  %v1559_v60 = vsub.f32 %v1534_v55, %v1522_v51 }
0x1c0d   :  { %v1549_v59 = vpop.permute.xlu0 %1548 }
0x1c0e   :  { %v1561_v0 = vrot.slane %v1559_v60, 4 }
0x1c16   :  { %v3036_v56 = vpop.eup %3035 }
0x1c17   :  { %1537 = vrot.lane.b32.xlu1 %v3036_v56, %s3113_s24 }
0x1c89   :  { %v1538_v57 = vpop.permute.xlu1 %1537 }
0x1c8a   :  { %v3457_v3 = vmul.f32 %v3034_v47, %v1538_v57 }
0x1c8c   :  { %v1551_v10 = vsub.f32 %v3457_v3, %v1549_v59 }
0x1c8e   :  { %v1553_v63 = vrot.slane %v1551_v10, 4 }
0x1c90   :  { %1554 = vrot.lane.b32.xlu1 %v1553_v63, %s3118_s30 }
0x1c94   :  { %1562 = vrot.lane.b32.xlu1 %v1561_v0, %s3119_s11 }
0x1d02   :  { %v1555_v4 = vpop.permute.xlu1 %1554 }
0x1d03   :  { %v1557_v6 = vmul.f32 %v1555_v4, %v3349_v20 }
0x1d05   :  { %v1558_v14 = vadd.f32 %v1557_v6, %v1421_v21 }
0x1d06   :  { %v1563_v1 = vpop.permute.xlu1 %1562 }
0x1d07   :  { %v1565_v15 = vmul.f32 %v1563_v1, %v3349_v20  ;;  %2833 = vmatmul.mubr.msk.f32.vlgmr.msra.gmra.mrb[14].mxu1 %vm42_vm0, %v1558_v14 }
0x1d08   :  { %2841 = vmatpush3.msra.mxu1 %v3361_v27  ;;  %2842 = vmatprep.mubr.msk.f32.mxu1 %vm3110_vm1, %v3109_v5 }
0x1d09   :  { %v1566_v17 = vadd.f32 %v1565_v15, %v1428_v24  ;;  %2850 = vmatprep.subr.mxu1 %v3109_v5 }
0x1d0b   :  { %1657 = vrot.lane.b32.xlu1 %v1566_v17, %s3120_s12 }
0x1d7d   :  { %v1658_v41 = vpop.permute.xlu1 %1657 }
0x1dda   :  { %v1641_v18 = vpop.f32.mrb[14].mxu1 }
0x1ddb   :  { %1646 = vrot.lane.b32.xlu0 %v1641_v18, %s3117_s4  ;;  %v2834_v19 = vpop.f32.mrb[15].mxu1 }
0x1e4d   :  { %v1647_v21 = vpop.permute.xlu0 %1646 }
0x1e4e   :  { %v1649_v23 = vadd.f32 %v1647_v21, %v3227_v11 }
0x1e50   :  { %3037 = vtanh.f32 %v1649_v23  ;;  %v1650_v30 = vsub.f32 0.0, %v1649_v23 }
0x1e52   :  { %v1651_v33 = vmul.f32 1.442695, %v1650_v30 }
0x1e54   :  { %3039 = vpow2.f32 %v1651_v33 }
0x1e5a   :  { %v3038_v28 = vpop.eup %3037 }
0x1e5b   :  { %1662 = vrot.lane.b32.xlu0 %v3038_v28, %s3112_s1 }
0x1e5e   :  { %v3040_v35 = vpop.eup %3039 }
0x1e5f   :  { %v1653_v24 = vadd.f32 1.0, %v3040_v35 }
0x1e61   :  { %3041 = vrcp.f32 %v1653_v24 }
0x1e6b   :  { %v3042_v36 = vpop.eup %3041 }
0x1e6c   :  { %v1660_v43 = vmul.f32 %v3042_v36, %v1658_v41 }
0x1ecd   :  { %v1663_v37 = vpop.permute.xlu0 %1662 }
0x1ece   :  { %v1665_v39 = vmul.f32 %v3042_v36, %v1663_v37 }
0x1ed0   :  { %1667 = vrot.lane.b32.xlu0 %v1665_v39, %s3113_s24 }
0x1ed4   :  { %1678 = vrot.lane.b32.xlu0 %v1558_v14, %s3121_s13 }
0x1f42   :  { %v1668_v11 = vpop.permute.xlu0 %1667 }
0x1f43   :  { %v1670_v40 = vadd.f32 %v1668_v11, %v1660_v43 }
0x1f45   :  { %3043 = vtanh.f32 %v1670_v40  ;;  %v1688_v51 = vsub.f32 %v1670_v40, %v1658_v41 }
0x1f46   :  { %v1679_v49 = vpop.permute.xlu0 %1678 }
0x1f47   :  { %v1689_v53 = vmul.f32 %v1688_v51, %v3326_v44 }
0x1f4f   :  { %v3044_v45 = vpop.eup %3043 }
0x1f50   :  { %1673 = vrot.lane.b32.xlu1 %v3044_v45, %s3113_s24 }
0x1fc2   :  { %v1674_v47 = vpop.permute.xlu1 %1673 }
0x1fc3   :  { %v3476_v48 = vmul.f32 %v3042_v36, %v1674_v47 }
0x1fc5   :  { %v1681_v50 = vsub.f32 %v3476_v48, %v1679_v49 }
0x1fc7   :  { %v1682_v52 = vmul.f32 %v1681_v50, %v3326_v44 }
0x1fc9   :  { %1684 = vrot.lane.b32.xlu1 %v1682_v52, %s3118_s30 }
0x1fcd   :  { %1691 = vrot.lane.b32.xlu1 %v1689_v53, %s3119_s11 }
0x203b   :  { %v1685_v55 = vpop.permute.xlu1 %1684 }
0x203c   :  { %v1687_v56 = vadd.f32 %v1685_v55, %v1558_v14 }
0x203e   :  { %2838 = vmatmul.mubr.msk.f32.vlgmr.msra.gmra.mrb[12].mxu0 %vm42_vm0, %v1687_v56  ;;  %v1813_v28 = vrot.slane %v1687_v56, 4 }
0x203f   :  { %v1692_v57 = vpop.permute.xlu1 %1691  ;;  %2846 = vmatpush3.msra.mxu0 %v3361_v27  ;;  %2847 = vmatprep.mubr.msk.f32.mxu0 %vm3110_vm1, %v3109_v5 }
0x2040   :  { %v1694_v59 = vadd.f32 %v1692_v57, %v1566_v17 }
0x2042   :  { %v1786_v10 = vrot.slane %v1694_v59, 4 }
0x2044   :  { %1787 = vrot.lane.b32.xlu1 %v1786_v10, %s3120_s12 }
0x20b6   :  { %v1788_v30 = vpop.permute.xlu1 %1787 }
0x2111   :  { %v1769_v60 = vpop.f32.mrb[12].mxu0 }
0x2112   :  { %v1774_v63 = vrot.slane %v1769_v60, 4  ;;  %v2839_v0 = vpop.f32.mrb[13].mxu0 }
0x2114   :  { %1775 = vrot.lane.b32.xlu0 %v1774_v63, %s3117_s4 }
0x2186   :  { %v1776_v4 = vpop.permute.xlu0 %1775 }
0x2187   :  { %v1778_v6 = vadd.f32 %v3229_v12, %v1776_v4 }
0x2189   :  { %3045 = vtanh.f32 %v1778_v6  ;;  %v1779_v1 = vsub.f32 0.0, %v1778_v6 }
0x218b   :  { %v1780_v15 = vmul.f32 1.442695, %v1779_v1 }
0x218d   :  { %3047 = vpow2.f32 %v1780_v15 }
0x2193   :  { %v3046_v14 = vpop.eup %3045 }
0x2194   :  { %1792 = vrot.lane.b32.xlu0 %v3046_v14, %s3112_s1 }
0x2197   :  { %v3048_v18 = vpop.eup %3047 }
0x2198   :  { %v1782_v17 = vadd.f32 1.0, %v3048_v18 }
0x219a   :  { %3049 = vrcp.f32 %v1782_v17 }
0x21a4   :  { %v3050_v19 = vpop.eup %3049 }
0x21a5   :  { %v1790_v33 = vmul.f32 %v3050_v19, %v1788_v30 }
0x2206   :  { %v1793_v21 = vpop.permute.xlu0 %1792 }
0x2207   :  { %v1795_v23 = vmul.f32 %v3050_v19, %v1793_v21 }
0x2209   :  { %1797 = vrot.lane.b32.xlu0 %v1795_v23, %s3113_s24 }
0x220d   :  { %1814 = vrot.lane.b32.xlu0 %v1813_v28, %s3121_s13 }
0x227b   :  { %v1798_v35 = vpop.permute.xlu0 %1797 }
0x227c   :  { %v1800_v24 = vadd.f32 %v1798_v35, %v1790_v33 }
0x227e   :  { %3051 = vtanh.f32 %v1800_v24  ;;  %v1825_v11 = vsub.f32 %v1800_v24, %v1788_v30 }
0x227f   :  { %v1815_v41 = vpop.permute.xlu0 %1814 }
0x2280   :  { %v1827_v45 = vrot.slane %v1825_v11, 4 }
0x2288   :  { %v3052_v36 = vpop.eup %3051 }
0x2289   :  { %1803 = vrot.lane.b32.xlu1 %v3052_v36, %s3113_s24 }
0x22fb   :  { %v1804_v37 = vpop.permute.xlu1 %1803 }
0x22fc   :  { %v3494_v39 = vmul.f32 %v3050_v19, %v1804_v37 }
0x22fe   :  { %v1817_v43 = vsub.f32 %v3494_v39, %v1815_v41 }
0x2300   :  { %v1819_v40 = vrot.slane %v1817_v43, 4 }
0x2302   :  { %1820 = vrot.lane.b32.xlu1 %v1819_v40, %s3118_s30 }
0x2306   :  { %1828 = vrot.lane.b32.xlu1 %v1827_v45, %s3119_s11 }
0x2374   :  { %v1821_v47 = vpop.permute.xlu1 %1820 }
0x2375   :  { %v1823_v49 = vmul.f32 %v1821_v47, %v3304_v2 }
0x2377   :  { %v1824_v50 = vadd.f32 %v1823_v49, %v1687_v56 }
0x2378   :  { %v1829_v51 = vpop.permute.xlu1 %1828 }
0x2379   :  { %v1831_v52 = vmul.f32 %v1829_v51, %v3304_v2  ;;  %2843 = vmatmul.mubr.msk.f32.vlgmr.msra.gmra.mrb[16].mxu1 %vm42_vm0, %v1824_v50 }
0x237a   :  { %2851 = vmatpush3.msra.mxu1 %v3361_v27  ;;  %2852 = vmatprep.mubr.msk.f32.mxu1 %vm3110_vm1, %v3109_v5 }
0x237b   :  { %v1832_v53 = vadd.f32 %v1831_v52, %v1694_v59 }
0x237d   :  { %1923 = vrot.lane.b32.xlu1 %v1832_v53, %s3120_s12 }
0x23ef   :  { %v1924_v1 = vpop.permute.xlu1 %1923 }
0x244c   :  { %v1907_v55 = vpop.f32.mrb[16].mxu1 }
0x244d   :  { %1912 = vrot.lane.b32.xlu0 %v1907_v55, %s3117_s4  ;;  %v2844_v57 = vpop.f32.mrb[17].mxu1 }
0x24bf   :  { %v1913_v10 = vpop.permute.xlu0 %1912 }
0x24c0   :  { %v1915_v56 = vadd.f32 %v3229_v12, %v1913_v10 }
0x24c2   :  { %3053 = vtanh.f32 %v1915_v56  ;;  %v1916_v63 = vsub.f32 0.0, %v1915_v56 }
0x24c4   :  { %v1917_v0 = vmul.f32 1.442695, %v1916_v63 }
0x24c6   :  { %3055 = vpow2.f32 %v1917_v0 }
0x24cc   :  { %v3054_v60 = vpop.eup %3053 }
0x24cd   :  { %1928 = vrot.lane.b32.xlu0 %v3054_v60, %s3112_s1 }
0x24d0   :  { %v3056_v27 = vpop.eup %3055 }
0x24d1   :  { %v1919_v4 = vadd.f32 1.0, %v3056_v27 }
0x24d3   :  { %3057 = vrcp.f32 %v1919_v4 }
0x24dd   :  { %v3058_v59 = vpop.eup %3057 }
0x24de   :  { %v1926_v15 = vmul.f32 %v3058_v59, %v1924_v1 }
0x253f   :  { %v1929_v6 = vpop.permute.xlu0 %1928 }
0x2540   :  { %v1931_v14 = vmul.f32 %v3058_v59, %v1929_v6 }
0x2542   :  { %1933 = vrot.lane.b32.xlu0 %v1931_v14, %s3113_s24 }
0x2546   :  { %1944 = vrot.lane.b32.xlu0 %v1824_v50, %s3121_s13 }
0x25b4   :  { %v1934_v12 = vpop.permute.xlu0 %1933 }
0x25b5   :  { %v1936_v18 = vadd.f32 %v1934_v12, %v1926_v15 }
0x25b7   :  { %3059 = vtanh.f32 %v1936_v18  ;;  %v1954_v30 = vsub.f32 %v1936_v18, %v1924_v1 }
0x25b8   :  { %v1945_v23 = vpop.permute.xlu0 %1944 }
0x25b9   :  { %v1955_v35 = vmul.f32 %v1954_v30, %v3284_v34 }
0x25c1   :  { %v3060_v17 = vpop.eup %3059 }
0x25c2   :  { %1939 = vrot.lane.b32.xlu1 %v3060_v17, %s3113_s24 }
0x2634   :  { %v1940_v19 = vpop.permute.xlu1 %1939 }
0x2635   :  { %v3512_v21 = vmul.f32 %v3058_v59, %v1940_v19 }
0x2637   :  { %v1947_v28 = vsub.f32 %v3512_v21, %v1945_v23 }
0x2639   :  { %v1948_v33 = vmul.f32 %v1947_v28, %v3284_v34 }
0x263b   :  { %1950 = vrot.lane.b32.xlu1 %v1948_v33, %s3118_s30 }
0x263f   :  { %1957 = vrot.lane.b32.xlu1 %v1955_v35, %s3119_s11 }
0x26ad   :  { %v1951_v24 = vpop.permute.xlu1 %1950 }
0x26ae   :  { %v1953_v36 = vadd.f32 %v1951_v24, %v1824_v50  ;;  %v1135_v24 = vsub.f32 0.0, %v3428_v46 }
0x26b0   :  { %2848 = vmatmul.mubr.msk.f32.vlgmr.msra.gmra.mrb[14].mxu0 %vm42_vm0, %v1953_v36  ;;  %v2079_v60 = vrot.slane %v1953_v36, 4 }
0x26b1   :  { %v1958_v37 = vpop.permute.xlu1 %1957 }
0x26b2   :  { %v3520_v41 = vadd.f32 %v1958_v37, %v1832_v53  ;;  %v1136_v37 = vmul.f32 1.442695, %v1135_v24 }
0x26b4   :  { %v2052_v43 = vrot.slane %v3520_v41, 4 }
0x26b6   :  { %2053 = vrot.lane.b32.xlu1 %v2052_v43, %s3120_s12 }
0x2728   :  { %v2054_v63 = vpop.permute.xlu1 %2053 }
0x2783   :  { %v2035_v11 = vpop.f32.mrb[14].mxu0 }
0x2784   :  { %v2040_v40 = vrot.slane %v2035_v11, 4  ;;  %v2849_v45 = vpop.f32.mrb[15].mxu0 }
0x2786   :  { %2041 = vrot.lane.b32.xlu0 %v2040_v40, %s3117_s4 }
0x27f8   :  { %v2042_v47 = vpop.permute.xlu0 %2041 }
0x27f9   :  { %v2044_v49 = vadd.f32 %v2042_v47, %v3231_v13 }
0x27fb   :  { %3061 = vtanh.f32 %v2044_v49  ;;  %v2045_v50 = vsub.f32 0.0, %v2044_v49 }
0x27fd   :  { %v2046_v52 = vmul.f32 1.442695, %v2045_v50 }
0x27ff   :  { %3063 = vpow2.f32 %v2046_v52 }
0x2805   :  { %v3062_v51 = vpop.eup %3061 }
0x2806   :  { %2058 = vrot.lane.b32.xlu0 %v3062_v51, %s3112_s1 }
0x2809   :  { %v3064_v53 = vpop.eup %3063 }
0x280a   :  { %v2048_v55 = vadd.f32 1.0, %v3064_v53 }
0x280c   :  { %3065 = vrcp.f32 %v2048_v55 }
0x2816   :  { %v3066_v57 = vpop.eup %3065 }
0x2817   :  { %v2056_v0 = vmul.f32 %v3066_v57, %v2054_v63 }
0x2878   :  { %v2059_v10 = vpop.permute.xlu0 %2058 }
0x2879   :  { %v2061_v56 = vmul.f32 %v3066_v57, %v2059_v10  ;;  %v1048_v10 = vsub.f32 %v3388_v9, %v3384_v61  ;;  %v1808_v9 = vrot.slane %v3494_v39, 4 }
0x287b   :  { %2063 = vrot.lane.b32.xlu0 %v2061_v56, %s3113_s24  ;;  %v1049_v56 = vmul.f32 %v1048_v10, %v3399_v8 }
0x287f   :  { %2080 = vrot.lane.b32.xlu0 %v2079_v60, %s3121_s13 }
0x28ed   :  { %v2064_v27 = vpop.permute.xlu0 %2063 }
0x28ee   :  { %v2066_v4 = vadd.f32 %v2064_v27, %v2056_v0  ;;  %v1050_v0 = vadd.f32 %v1049_v56, %v3384_v61 }
0x28f0   :  { %3067 = vtanh.f32 %v2066_v4  ;;  %v2091_v12 = vsub.f32 %v2066_v4, %v2054_v63  ;;  %v1142_v4 = vrot.slane %v1050_v0, 4 }
0x28f1   :  { %v2081_v1 = vpop.permute.xlu0 %2080  ;;  %3069 = vtanh.f32 %v3428_v46 }
0x28f2   :  { %v2093_v17 = vrot.slane %v2091_v12, 4  ;;  %3071 = vpow2.f32 %v1136_v37  ;;  %v390_v12 = vrot.slane %v3256_v54, 4 }
0x28fa   :  { %v3068_v59 = vpop.eup %3067 }
0x28fb   :  { %2069 = vrot.lane.b32.xlu1 %v3068_v59, %s3113_s24  ;;  %v3070_v19 = vpop.eup %3069 }
0x28fc   :  { %v3072_v40 = vpop.eup %3071 }
0x296d   :  { %v2070_v6 = vpop.permute.xlu1 %2069 }
0x296e   :  { %v3530_v14 = vmul.f32 %v3066_v57, %v2070_v6 }
0x2970   :  { %v2083_v15 = vsub.f32 %v3530_v14, %v2081_v1 }
0x2972   :  { %v2085_v18 = vrot.slane %v2083_v15, 4 }
0x2974   :  { %2086 = vrot.lane.b32.xlu1 %v2085_v18, %s3118_s30 }
0x2978   :  { %2094 = vrot.lane.b32.xlu1 %v2093_v17, %s3119_s11 }
0x297c   :  { %1146 = vrot.lane.b32.xlu1 %v3070_v19, %s3112_s1 }
0x29e6   :  { %v2087_v23 = vpop.permute.xlu1 %2086 }
0x29e7   :  { %v2089_v28 = vmul.f32 %v2087_v23, %v3261_v58  ;;  %v2074_v23 = vrot.slane %v3530_v14, 4 }
0x29e9   :  { %v3538_v30 = vadd.f32 %v2089_v28, %v1953_v36  ;;  %v1138_v36 = vadd.f32 1.0, %v3072_v40  ;;  %v1542_v28 = vrot.slane %v3457_v3, 4 }
0x29ea   :  { %v2095_v45 = vpop.permute.xlu1 %2094 }
0x29eb   :  { %2853 = vmatmul.mubr.msk.f32.vlgmr.msra.gmra.mrb[18].mxu1 %vm42_vm0, %v3538_v30  ;;  %v2097_v47 = vmul.f32 %v2095_v45, %v3261_v58  ;;  %v2229_v45 = vld [vmem:[%s3753_s5] sm:$0xff] }
0x29ec   :  { %2881 = vmatprep.mubr.msk.f32.mxu1 %vm3110_vm1, %v3109_v5 }
0x29ed   :  { %v2098_v51 = vadd.f32 %v2097_v47, %v3520_v41  ;;  %v2230_v47 = vld [vmem:[%s3753_s5 + $0x8] sm:$0xff] }
0x29ee   :  { %v1147_v50 = vpop.permute.xlu1 %1146 }
0x2abe   :  { %v2173_v33 = vpop.f32.mrb[18].mxu1 }
0x2abf   :  { %2178 = vrot.lane.b32.xlu0 %v2173_v33, %s3117_s4  ;;  %v2854_v35 = vpop.f32.mrb[19].mxu1  ;;  %v649_v33 = vrot.slane %v3300_v62, 4 }
0x2ac0   :  { %v526_v35 = vmul.f32 %v3284_v34, %v3281_v31  ;;  %v1044_v31 = vmul.f32 %v3399_v8, %v3395_v22  ;;  %v2907_v22 = vpack.c.bf16 %v2230_v47, %v2229_v45 }
0x2ac2   :  { %2908 = vmatprep.subr.bf16.mxu0 %v2907_v22 }
0x2ac3   :  { %2910 = vmatpush3.bf16.msra.mxu0 %v2907_v22 }
0x2b31   :  { %v2179_v43 = vpop.permute.xlu0 %2178 }
0x2b32   :  { %v2181_v11 = vadd.f32 %v2179_v43, %v3231_v13 }
0x2b34   :  { %3073 = vtanh.f32 %v2181_v11  ;;  %v2182_v13 = vsub.f32 0.0, %v2181_v11 }
0x2b35   :  { %3075 = vrcp.f32 %v1138_v36 }
0x2b36   :  { %v2183_v53 = vmul.f32 1.442695, %v2182_v13  ;;  %v1943_v13 = vmul.f32 %v3512_v21, %v3284_v34 }
0x2b38   :  { %3077 = vpow2.f32 %v2183_v53  ;;  %v785_v53 = vmul.f32 %v3326_v44, %v3323_v42 }
0x2b3e   :  { %v3074_v49 = vpop.eup %3073 }
0x2b3f   :  { %2194 = vrot.lane.b32.xlu0 %v3074_v49, %s3112_s1  ;;  %v3076_v46 = vpop.eup %3075 }
0x2b40   :  { %v1149_v52 = vmul.f32 %v3076_v46, %v1147_v50  ;;  %v1144_v59 = vmul.f32 %v3076_v46, %v1142_v4 }
0x2b42   :  { %v3078_v55 = vpop.eup %3077 }
0x2b43   :  { %2189 = vrot.lane.b32.xlu0 %v2098_v51, %s3120_s12  ;;  %v2185_v57 = vadd.f32 1.0, %v3078_v55  ;;  %v1677_v51 = vmul.f32 %v3476_v48, %v3326_v44 }
0x2b45   :  { %3079 = vrcp.f32 %v2185_v57 }
0x2b47   :  { %1151 = vrot.lane.b32.xlu0 %v1149_v52, %s3113_s24  ;;  %v1411_v52 = vmul.f32 %v3437_v7, %v3399_v8 }
0x2b4f   :  { %v3080_v60 = vpop.eup %3079 }
0x2bb1   :  { %v2195_v41 = vpop.permute.xlu0 %2194 }
0x2bb2   :  { %v2197_v63 = vmul.f32 %v3080_v60, %v2195_v41 }
0x2bb4   :  { %2199 = vrot.lane.b32.xlu1 %v2197_v63, %s3113_s24 }
0x2bb5   :  { %v2190_v27 = vpop.permute.xlu0 %2189 }
0x2bb6   :  { %v2192_v61 = vmul.f32 %v3080_v60, %v2190_v27 }
0x2bb9   :  { %v1152_v6 = vpop.permute.xlu0 %1151 }
0x2bba   :  { %v1154_v1 = vadd.f32 %v1152_v6, %v1144_v59 }
0x2bbc   :  { %3081 = vtanh.f32 %v1154_v1 }
0x2bc6   :  { %v3082_v15 = vpop.eup %3081 }
0x2bc7   :  { %1157 = vrot.lane.b32.xlu0 %v3082_v15, %s3113_s24 }
0x2bcb   :  { %1809 = vrot.lane.b32.xlu0 %v1808_v9, %s3118_s30 }
0x2bcf   :  { %391 = vrot.lane.b32.xlu0 %v390_v12, %s3114_s25 }
0x2bd3   :  { %274 = vrot.lane.b32.xlu0 %v3240_v32, %s3114_s25 }
0x2c26   :  { %v2200_v18 = vpop.permute.xlu1 %2199 }
0x2c27   :  { %v2202_v17 = vadd.f32 %v2200_v18, %v2192_v61  ;;  %v1172_v61 = vrot.slane %v3403_v26, 4 }
0x2c29   :  { %3083 = vtanh.f32 %v2202_v17 }
0x2c33   :  { %v3084_v19 = vpop.eup %3083 }
0x2c34   :  { %2205 = vrot.lane.b32.xlu1 %v3084_v19, %s3113_s24 }
0x2c38   :  { %2075 = vrot.lane.b32.xlu1 %v2074_v23, %s3118_s30 }
0x2c39   :  { %v1158_v39 = vpop.permute.xlu0 %1157 }
0x2c3a   :  { %v3576_v3 = vmul.f32 %v3076_v46, %v1158_v39  ;;  %v908_v46 = vrot.slane %v3345_v16, 4 }
0x2c3c   :  { %1543 = vrot.lane.b32.xlu1 %v1542_v28, %s3118_s30  ;;  %v1167_v62 = vrot.slane %v3576_v3, 4  ;;  %v1174_v17 = vsub.f32 %v3576_v3, %v1172_v61  ;;  %v2478_v61 = vld [vmem:[%s3754_s6 + $0x38] sm:$0xff] }
0x2c3d   :  { %v1810_v54 = vpop.permute.xlu0 %1809 }
0x2c3e   :  { %v1812_v37 = vmul.f32 %v1810_v54, %v3304_v2  ;;  %v1176_v19 = vrot.slane %v1174_v17, 4 }
0x2c40   :  { %650 = vrot.lane.b32.xlu1 %v649_v33, %s3114_s25 }
0x2c41   :  { %v392_v32 = vpop.permute.xlu0 %391 }
0x2c42   :  { %v394_v24 = vmul.f32 %v392_v32, %v3261_v58 }
0x2c44   :  { %421 = vst.msk [vmem:[#allocation2 + $0x4] sm:$0xf] %vm277_vm10, %v394_v24  ;;  %534 = vrot.lane.b32.xlu1 %v526_v35, %s3114_s25 }
0x2c45   :  { %v275_v14 = vpop.permute.xlu0 %274 }
0x2c46   :  { %278 = vst.msk [vmem:[#allocation2] sm:$0xf] %vm277_vm10, %v275_v14 }
0x2c48   :  { %1834 = vrot.lane.b32.xlu1 %v1812_v37, %s3113_s24 }
0x2c4c   :  { %1168 = vrot.lane.b32.xlu1 %v1167_v62, %s3114_s25 }
0x2c50   :  { %1052 = vrot.lane.b32.xlu1 %v1044_v31, %s3114_s25 }
0x2ca6   :  { %v2206_v43 = vpop.permute.xlu1 %2205 }
0x2ca7   :  { %v3586_v11 = vmul.f32 %v3080_v60, %v2206_v43 }
0x2ca9   :  { %v2209_v40 = vmul.f32 %v3586_v11, %v3237_v29 }
0x2caa   :  { %v2076_v36 = vpop.permute.xlu1 %2075 }
0x2cab   :  { %v2078_v49 = vmul.f32 %v2076_v36, %v3261_v58  ;;  %2221 = vrot.lane.b32.xlu1 %v2209_v40, %s3119_s11 }
0x2cad   :  { %2100 = vrot.lane.b32.xlu0 %v2078_v49, %s3113_s24 }
0x2cae   :  { %v1544_v50 = vpop.permute.xlu1 %1543 }
0x2caf   :  { %1696 = vrot.lane.b32.xlu1 %v1677_v51, %s3119_s11  ;;  %v1546_v34 = vmul.f32 %v1544_v50, %v3349_v20 }
0x2cb1   :  { %909 = vrot.lane.b32.xlu0 %v908_v46, %s3114_s25 }
0x2cb2   :  { %v651_v58 = vpop.permute.xlu1 %650 }
0x2cb3   :  { %v653_v48 = vmul.f32 %v651_v58, %v3304_v2  ;;  %1430 = vrot.lane.b32.xlu1 %v1411_v52, %s3119_s11 }
0x2cb5   :  { %680 = vst.msk [vmem:[#allocation2 + $0xc] sm:$0xf] %vm277_vm10, %v653_v48  ;;  %1962 = vrot.lane.b32.xlu0 %v1943_v13, %s3119_s11  ;;  %s3123_s11 = smov 24  }
0x2cb6   :  { %v535_v16 = vpop.permute.xlu1 %534 }
0x2cb7   :  { %537 = vst.msk [vmem:[#allocation2 + $0x8] sm:$0xf] %vm277_vm10, %v535_v16 }
0x2cb9   :  { %793 = vrot.lane.b32.xlu0 %v785_v53, %s3114_s25 }
0x2cba   :  { %v1835_v8 = vpop.permute.xlu1 %1834 }
0x2cbb   :  { %1837 = vst.msk [vmem:[#allocation2 + $0xc] sm:$0xf] %vm1304_vm11, %v1835_v8 }
0x2cbd   :  { %1568 = vrot.lane.b32.xlu0 %v1546_v34, %s3113_s24 }
0x2cbe   :  { %v1169_v2 = vpop.permute.xlu1 %1168 }
0x2cbf   :  { %v1171_v7 = vmul.f32 %v1169_v2, %v3414_v25 }
0x2cc1   :  { %1186 = vst.msk [vmem:[#allocation2 + $0x1c] sm:$0xf] %vm277_vm10, %v1171_v7  ;;  %1301 = vrot.lane.b32.xlu0 %v3417_v38, %s3113_s24  ;;  %v3122_v7 = vmov 0.0|0.0  }
0x2cc2   :  { %v1053_v42 = vpop.permute.xlu1 %1052  ;;  %2911 = vmatprep.subr.bf16.mxu1 %v3122_v7  ;;  %2923 = vmatprep.subr.bf16.mxu0 %v3122_v7 }
0x2cc3   :  { %1055 = vst.msk [vmem:[#allocation2 + $0x18] sm:$0xf] %vm277_vm10, %v1053_v42  ;;  %v2471_v42 = vld [vmem:[%s3754_s6] sm:$0xff] }
0x2d1d   :  { %v2222_v44 = vpop.permute.xlu1 %2221 }
0x2d1e   :  { %2224 = vst.msk [vmem:[#allocation2] sm:$0xf] %vm1304_vm11, %v2222_v44  ;;  %v2472_v44 = vld [vmem:[%s3754_s6 + $0x8] sm:$0xff] }
0x2d1f   :  { %v2101_v21 = vpop.permute.xlu0 %2100 }
0x2d20   :  { %2103 = vst.msk [vmem:[#allocation2 + $0x4] sm:$0xf] %vm1304_vm11, %v2101_v21  ;;  %v2912_v21 = vpack.c.bf16 %v2472_v44, %v2471_v42  ;;  %v2572_v42 = vld [vmem:[%s3755_s8 + $0x28] sm:$0xff] }
0x2d21   :  { %v1697_v55 = vpop.permute.xlu1 %1696 }
0x2d22   :  { %2913 = vmatpush3.bf16.msra.mxu1 %v2912_v21  ;;  %v2573_v21 = vld [vmem:[%s3755_s8 + $0x30] sm:$0xff] }
0x2d23   :  { %v910_v57 = vpop.permute.xlu0 %909  ;;  %2914 = vmatprep.subr.bf16.mxu1 %v3122_v7 }
0x2d24   :  { %v912_v10 = vmul.f32 %v910_v57, %v3349_v20  ;;  %v2473_v57 = vld [vmem:[%s3754_s6 + $0x10] sm:$0xff] }
0x2d25   :  { %v1431_v56 = vpop.permute.xlu1 %1430 }
0x2d26   :  { %939 = vst.msk [vmem:[#allocation2 + $0x14] sm:$0xf] %vm277_vm10, %v912_v10  ;;  %v2474_v10 = vld [vmem:[%s3754_s6 + $0x18] sm:$0xff] }
0x2d27   :  { %1433 = vst.msk [vmem:[#allocation2 + $0x18] sm:$0xf] %vm1304_vm11, %v1431_v56  ;;  %v1963_v38 = vpop.permute.xlu0 %1962  ;;  %v2225_v60 = vld [vmem:[#allocation2] sm:$0xff] }
0x2d28   :  { %1965 = vst.msk [vmem:[#allocation2 + $0x8] sm:$0xf] %vm1304_vm11, %v1963_v38  ;;  %2859 = vmatprep.mubr.msk.f32.mxu0 %vm2231_vm12, %v2225_v60  ;;  %v2915_v38 = vpack.c.bf16 %v2474_v10, %v2473_v57  ;;  %v2575_v10 = vld [vmem:[%s3755_s8 + $0x40] sm:$0xff] }
0x2d2a   :  { %2916 = vmatpush3.bf16.msra.mxu1 %v2915_v38 }
0x2d2b   :  { %v794_v41 = vpop.permute.xlu0 %793  ;;  %2917 = vmatprep.subr.bf16.mxu1 %v3122_v7 }
0x2d2c   :  { %796 = vst.msk [vmem:[#allocation2 + $0x10] sm:$0xf] %vm277_vm10, %v794_v41 }
0x2d2d   :  { %1699 = vst.msk [vmem:[#allocation2 + $0x10] sm:$0xf] %vm1304_vm11, %v1697_v55 }
0x2d2f   :  { %v1569_v63 = vpop.permute.xlu0 %1568  ;;  %v2226_v0 = vld [vmem:[#allocation2 + $0x8] sm:$0xff] }
0x2d30   :  { %1571 = vst.msk [vmem:[#allocation2 + $0x14] sm:$0xf] %vm1304_vm11, %v1569_v63  ;;  %2860 = vmatmul.mubr.msk.f32.vlgmr.msra.gmra.mrb[16].mxu0 %vm2231_vm12, %v2226_v0  ;;  %v2475_v63 = vld [vmem:[%s3754_s6 + $0x20] sm:$0xff]  ;;  %v2476_v0 = vld [vmem:[%s3754_s6 + $0x28] sm:$0xff] }
0x2d33   :  { %v1302_v20 = vpop.permute.xlu0 %1301 }
0x2d34   :  { %1305 = vst.msk [vmem:[#allocation2 + $0x1c] sm:$0xf] %vm1304_vm11, %v1302_v20 }
0x2d37   :  { %v2227_v27 = vld [vmem:[#allocation2 + $0x10] sm:$0xff] }
0x2d38   :  { %2862 = vmatprep.mubr.msk.f32.mxu0 %vm2231_vm12, %v2227_v27 }
0x2d3b   :  { %v2228_v4 = vld [vmem:[#allocation2 + $0x18] sm:$0xff] }
0x2d3c   :  { %2863 = vmatmul.mubr.msk.f32.gmra.mrb[18].mxu0 %vm2231_vm12, %v2228_v4 }
0x2d3d   :  { %2904 = vmatprep.mubr.msk.f32.mxu0 %vm3110_vm1, %v3109_v5  ;;  %vm2467_vm1 = vcmask 392192  }
0x2e03   :  { %v2861_v59 = vpop.f32.mrb[16].mxu0 }
0x2e04   :  { %v2347_v6 = vrot.slane %v2861_v59, 4  ;;  %v2310_v1 = vpop.f32.mrb[17].mxu0 }
0x2e05   :  { %v2330_v15 = vrot.slane %v2310_v1, 4 }
0x2e06   :  { %2348 = vrot.lane.b32.xlu1 %v2347_v6, %s3116_s27 }
0x2e07   :  { %2331 = vrot.lane.b32.xlu0 %v2330_v15, %s3116_s27 }
0x2e0b   :  { %2337 = vrot.lane.b32.xlu0 %v2861_v59, %s3114_s25 }
0x2e0f   :  { %v2864_v9 = vpop.f32.mrb[18].mxu0 }
0x2e10   :  { %v2320_v12 = vpop.f32.mrb[19].mxu0  ;;  %v2397_v5 = vrot.slane %v2864_v9, 4 }
0x2e11   :  { %v2372_v18 = vrot.slane %v2320_v12, 4  ;;  %2362 = vrot.lane.b32.xlu0 %v2320_v12, %s3114_s25 }
0x2e13   :  { %2373 = vrot.lane.b32.xlu1 %v2372_v18, %s3116_s27 }
0x2e15   :  { %2387 = vrot.lane.b32.xlu0 %v2864_v9, %s3114_s25 }
0x2e17   :  { %2398 = vrot.lane.b32.xlu1 %v2397_v5, %s3116_s27 }
0x2e19   :  { %1177 = vrot.lane.b32.xlu0 %v1176_v19, %s3114_s25 }
0x2e1b   :  { %2210 = vrot.lane.b32.xlu1 %v3538_v30, %s3121_s13 }
0x2e78   :  { %v2349_v39 = vpop.permute.xlu1 %2348 }
0x2e79   :  { %v2332_v23 = vpop.permute.xlu0 %2331  ;;  %v2351_v28 = vadd.f32 %v2349_v39, %v2310_v1  ;;  %v2360_v31 = vadd.f32 %v2861_v59, %v2349_v39 }
0x2e7a   :  { %v2334_v35 = vadd.f32 %v2332_v23, %v2310_v1 }
0x2e7d   :  { %v2338_v54 = vpop.permute.xlu0 %2337 }
0x2e7e   :  { %v2352_v33 = vadd.f32 %v2351_v28, %v2338_v54  ;;  %v2340_v3 = vadd.f32 %v2338_v54, %v2334_v35 }
0x2e80   :  { %3085 = vtanh.f32 %v2352_v33 }
0x2e83   :  { %v2363_v32 = vpop.permute.xlu0 %2362 }
0x2e84   :  { %v2365_v36 = vadd.f32 %v2363_v32, %v2360_v31 }
0x2e85   :  { %v2374_v24 = vpop.permute.xlu1 %2373 }
0x2e86   :  { %v2376_v14 = vadd.f32 %v2861_v59, %v2374_v24  ;;  %v2385_v45 = vadd.f32 %v2374_v24, %v2320_v12 }
0x2e87   :  { %v2388_v37 = vpop.permute.xlu0 %2387 }
0x2e88   :  { %v2377_v62 = vadd.f32 %v2376_v14, %v2363_v32  ;;  %v2390_v52 = vadd.f32 %v2388_v37, %v2385_v45 }
0x2e89   :  { %v2399_v43 = vpop.permute.xlu1 %2398 }
0x2e8a   :  { %3087 = vtanh.f32 %v2377_v62  ;;  %v2401_v40 = vadd.f32 %v2399_v43, %v2320_v12  ;;  %v3086_v51 = vpop.eup %3085  ;;  %v2410_v48 = vadd.f32 %v2864_v9, %v2399_v43  ;;  %v2477_v12 = vld [vmem:[%s3754_s6 + $0x30] sm:$0xff] }
0x2e8b   :  { %3089 = vtanh.f32 %v2340_v3  ;;  %v1178_v47 = vpop.permute.xlu0 %1177  ;;  %v2355_v58 = vrot.slane %v3086_v51, 4  ;;  %v2921_v17 = vpack.c.bf16 %v2478_v61, %v2477_v12 }
0x2e8c   :  { %v2402_v49 = vadd.f32 %v2401_v40, %v2388_v37  ;;  %v1180_v22 = vmul.f32 %v1178_v47, %v3414_v25 }
0x2e8d   :  { %v2211_v50 = vpop.permute.xlu1 %2210 }
0x2e8e   :  { %3091 = vtanh.f32 %v2402_v49  ;;  %v2213_v46 = vsub.f32 %v3586_v11, %v2211_v50  ;;  %1182 = vrot.lane.b32.xlu0 %v1180_v22, %s3115_s26 }
0x2e8f   :  { %3093 = vtanh.f32 %v2365_v36 }
0x2e90   :  { %v2214_v13 = vmul.f32 %v2213_v46, %v3237_v29  ;;  %3095 = vtanh.f32 %v2390_v52 }
0x2e91   :  { %3097 = vtanh.f32 %v2410_v48 }
0x2e92   :  { %2356 = vrot.lane.b32.xlu0 %v2355_v58, %s3113_s24  ;;  %2216 = vrot.lane.b32.xlu1 %v2214_v13, %s3118_s30  ;;  %3099 = vtanh.f32 %v2334_v35 }
0x2e94   :  { %v3088_v16 = vpop.eup %3087 }
0x2e95   :  { %v3090_v25 = vpop.eup %3089  ;;  %v2380_v53 = vrot.slane %v3088_v16, 4 }
0x2e96   :  { %2343 = vrot.lane.b32.xlu1 %v3090_v25, %s3113_s24  ;;  %v2567_v25 = vld [vmem:[%s3755_s8] sm:$0xff] }
0x2e97   :  { %2381 = vrot.lane.b32.xlu0 %v2380_v53, %s3113_s24  ;;  %v2568_v53 = vld [vmem:[%s3755_s8 + $0x8] sm:$0xff] }
0x2e98   :  { %v3092_v11 = vpop.eup %3091 }
0x2e99   :  { %v3094_v8 = vpop.eup %3093  ;;  %v2405_v34 = vrot.slane %v3092_v11, 4  ;;  %v2924_v11 = vpack.c.bf16 %v2568_v53, %v2567_v25 }
0x2e9a   :  { %2368 = vrot.lane.b32.xlu1 %v3094_v8, %s3113_s24  ;;  %v3096_v29 = vpop.eup %3095  ;;  %v2569_v8 = vld [vmem:[%s3755_s8 + $0x10] sm:$0xff] }
0x2e9b   :  { %2406 = vrot.lane.b32.xlu0 %v2405_v34, %s3113_s24  ;;  %v3098_v2 = vpop.eup %3097  ;;  %2925 = vmatpush3.bf16.msra.mxu0 %v2924_v11  ;;  %v2570_v34 = vld [vmem:[%s3755_s8 + $0x18] sm:$0xff] }
0x2e9c   :  { %v3100_v15 = vpop.eup %3099  ;;  %2926 = vmatprep.subr.bf16.mxu0 %v3122_v7 }
0x2e9e   :  { %2393 = vrot.lane.b32.xlu1 %v3096_v29, %s3113_s24  ;;  %v2927_v29 = vpack.c.bf16 %v2570_v34, %v2569_v8 }
0x2ea0   :  { %2928 = vmatpush3.bf16.msra.mxu0 %v2927_v29 }
0x2ea1   :  { %2929 = vmatprep.subr.bf16.mxu0 %v3122_v7 }
0x2ea2   :  { %2413 = vrot.lane.b32.xlu1 %v3098_v2, %s3113_s24  ;;  %v2571_v2 = vld [vmem:[%s3755_s8 + $0x20] sm:$0xff] }
0x2ea3   :  { %v2930_v44 = vpack.c.bf16 %v2572_v42, %v2571_v2 }
0x2ea5   :  { %2931 = vmatpush3.bf16.msra.mxu0 %v2930_v44 }
0x2ea6   :  { %2932 = vmatprep.subr.bf16.mxu0 %v3122_v7 }
0x2f00   :  { %v1183_v55 = vpop.permute.xlu0 %1182 }
0x2f01   :  { %v1185_v56 = vadd.f32 %v1183_v55, %v3403_v26  ;;  %v2918_v26 = vpack.c.bf16 %v2476_v0, %v2475_v63  ;;  %v2574_v55 = vld [vmem:[%s3755_s8 + $0x38] sm:$0xff] }
0x2f02   :  { %v2933_v57 = vpack.c.bf16 %v2574_v55, %v2573_v21 }
0x2f03   :  { %v2418_v60 = vrot.slane %v1185_v56, 2  ;;  %2919 = vmatpush3.bf16.msra.mxu1 %v2918_v26 }
0x2f04   :  { %v2217_v41 = vpop.permute.xlu1 %2216  ;;  %v2357_v59 = vpop.permute.xlu0 %2356  ;;  %2920 = vmatprep.subr.bf16.mxu1 %v3122_v7  ;;  %2934 = vmatpush3.bf16.msra.mxu0 %v2933_v57 }
0x2f05   :  { %v2219_v20 = vadd.f32 %v2217_v41, %v3538_v30  ;;  %v2420_v27 = vsub.f32 %v1185_v56, %v2418_v60  ;;  %v2427_v4 = vmax.f32 %v1185_v56, %v2418_v60  ;;  %v2429_v35 = vmul.f32 %v2418_v60, %v1185_v56  ;;  %2935 = vmatprep.subr.bf16.mxu0 %v3122_v7  ;;  %v2576_v56 = vld [vmem:[%s3755_s8 + $0x48] sm:$0xff]  ;;  %v2700_v41 = vld [vmem:[%s3757_s7] ss:$0 sm:$0xff] }
0x2f06   :  { %v2936_v38 = vpack.c.bf16 %v2576_v56, %v2575_v10  ;;  %v15_v60 = vstv %s3756_s9 }
0x2f07   :  { %v2423_v6 = vrot.slane %v2219_v20, 2  ;;  %v2421_v1 = vand.u32 2147483647, %v2420_v27  ;;  %2922 = vmatpush3.bf16.msra.mxu1 %v2921_v17  ;;  %16 = vst [vmem:[#allocation3] sm:$0x1] %v15_v60 }
0x2f08   :  { %v2344_v9 = vpop.permute.xlu1 %2343  ;;  %2937 = vmatpush3.bf16.msra.mxu0 %v2936_v38 }
0x2f09   :  { %v2346_v18 = vmax.f32 %v3100_v15, %v2344_v9  ;;  %2432 = vrot.lane.b32.xlu0 %v2421_v1, %s3114_s25  ;;  %v2425_v30 = vsub.f32 %v2219_v20, %v2423_v6  ;;  %v2428_v19 = vmax.f32 %v2219_v20, %v2423_v6  ;;  %v2382_v39 = vpop.permute.xlu0 %2381  ;;  %v2430_v32 = vmul.f32 %v2423_v6, %v2219_v20 }
0x2f0b   :  { %v2359_v5 = vmax.f32 %v2346_v18, %v2357_v59  ;;  %v2426_v23 = vand.u32 2147483647, %v2425_v30 }
0x2f0c   :  { %v2369_v28 = vpop.permute.xlu1 %2368 }
0x2f0d   :  { %v2371_v54 = vmax.f32 %v2359_v5, %v2369_v28  ;;  %2440 = vrot.lane.b32.xlu0 %v2428_v19, %s3123_s11  ;;  %2436 = vrot.lane.b32.xlu1 %v2426_v23, %s3113_s24  ;;  %v2407_v3 = vpop.permute.xlu0 %2406 }
0x2f0e   :  { %v2702_v15 = vld [vmem:[#allocation3] ss:$0 sm:$0xff] }
0x2f0f   :  { %v2384_v33 = vmax.f32 %v2371_v54, %v2382_v39 }
0x2f10   :  { %v2394_v24 = vpop.permute.xlu1 %2393 }
0x2f11   :  { %v2396_v14 = vmax.f32 %v2384_v33, %v2394_v24  ;;  %2448 = vrot.lane.b32.xlu0 %v2430_v32, %s3120_s12  ;;  %2444 = vrot.lane.b32.xlu1 %v2429_v35, %s3115_s26 }
0x2f13   :  { %v2409_v37 = vmax.f32 %v2396_v14, %v2407_v3 }
0x2f14   :  { %v2414_v62 = vpop.permute.xlu1 %2413 }
0x2f15   :  { %v2416_v31 = vmax.f32 %v2409_v37, %v2414_v62 }
0x2f17   :  { %v2455_v43 = vrot.slane %v2416_v31, 2  ;;  %2452 = vrot.lane.b32.xlu1 %v2416_v31, %s3120_s12 }
0x2f19   :  { %2456 = vrot.lane.b32.xlu0 %v2455_v43, %s3121_s13 }
0x2f7b   :  { %v2433_v40 = vpop.permute.xlu0 %2432 }
0x2f7f   :  { %v2437_v36 = vpop.permute.xlu1 %2436  ;;  %v2441_v45 = vpop.permute.xlu0 %2440 }
0x2f80   :  { %v2459_v47 = vsel %vm42_vm0, %v2433_v40, %v2437_v36  ;;  %vm2584_vm0 = vcmask 654336  }
0x2f81   :  { %v2460_v49 = vsel %vm2231_vm12, %v2459_v47, %v2427_v4 }
0x2f82   :  { %v2462_v22 = vsel %vm2461_vm13, %v2460_v49, %v2441_v45 }
0x2f83   :  { %v2445_v51 = vpop.permute.xlu1 %2444  ;;  %v2449_v50 = vpop.permute.xlu0 %2448 }
0x2f84   :  { %v2464_v46 = vsel %vm2463_vm14, %v2462_v22, %v2445_v51 }
0x2f85   :  { %v2466_v52 = vsel %vm2465_vm15, %v2464_v46, %v2449_v50 }
0x2f89   :  { %v2453_v58 = vpop.permute.xlu1 %2452 }
0x2f8a   :  { %v2468_v13 = vsel %vm2467_vm1, %v2466_v52, %v2453_v58 }
0x2f8b   :  { %v2457_v48 = vpop.permute.xlu0 %2456 }
0x2f8c   :  { %v2470_v16 = vsel %vm2469_vm2, %v2468_v13, %v2457_v48 }
0x2f8d   :  { %2882 = vmatmul.mubr.msk.f32.vlgmr.msra.gmra.mrb[20].mxu1 %vm2486_vm3, %v2470_v16 }
0x3060   :  { %v2556_v7 = vpop.f32.mrb[20].mxu1 }
0x3061   :  { %v2557_v63 = vadd.f32 %v2700_v41, %v2556_v7  ;;  %v2883_v0 = vpop.f32.mrb[21].mxu1 }
0x3063   :  { %v2561_v20 = vsub.f32 0.0, %v2557_v63  ;;  %v2560_v26 = vmax.f32 %v2557_v63, 0.0 }
0x3065   :  { %v2562_v27 = vmul.f32 1.442695, %v2561_v20 }
0x3067   :  { %3101 = vpow2.f32 %v2562_v27 }
0x3071   :  { %v3102_v4 = vpop.eup %3101 }
0x3072   :  { %v2564_v59 = vadd.f32 1.0, %v3102_v4 }
0x3074   :  { %3103 = vrcp.f32 %v2564_v59 }
0x307e   :  { %v3104_v6 = vpop.eup %3103 }
0x307f   :  { %v2566_v1 = vsel %vm2463_vm14, %v2560_v26, %v3104_v6 }
0x3080   :  { %2905 = vmatmul.mubr.msk.f32.vlgmr.msra.gmra.mrb[20].mxu0 %vm2584_vm0, %v2566_v1 }
0x3153   :  { %v2654_v9 = vpop.f32.mrb[20].mxu0 }
0x3154   :  { %v2655_v12 = vadd.f32 %v2702_v15, %v2654_v9  ;;  %v2906_v61 = vpop.f32.mrb[21].mxu0 }
0x3156   :  { %v2658_v18 = vsub.f32 0.0, %v2655_v12 }
0x3158   :  { %v2659_v30 = vmul.f32 1.442695, %v2658_v18 }
0x315a   :  { %3105 = vpow2.f32 %v2659_v30 }
0x3164   :  { %v3106_v17 = vpop.eup %3105 }
0x3165   :  { %v2661_v5 = vadd.f32 1.0, %v3106_v17 }
0x3167   :  { %3107 = vrcp.f32 %v2661_v5 }
0x3171   :  { %v3108_v19 = vpop.eup %3107 }
0x3172   :  { %2665 = vst.msk [vmem:[%s3758_s10] sm:$0x3] %vm2664_vm4, %v3108_v19 }

</bundles_post_ra>
